<compile_context>
chip_gen: v5e
topology: v5e:2x2
jax: 0.10.0
libtpu: 0.0.40
codegen_flags: <defaults>
</compile_context>

<pallas_src>
import functools
import math

import jax
import jax.numpy as jnp
from jax.experimental import pallas as pl
from jax.experimental.pallas import tpu as pltpu

from dataclasses import dataclass


@dataclass(frozen=True)
class Config:
    vocab_size: int = 96
    n_positions: int = 32
    n_embd: int = 32
    n_head: int = 4
    n_layer: int = 2
    layer_norm_epsilon: float = 1e-5
    audio_dim: int = 16


# --------------------------------------------------------------------------
# Fused Pallas kernel: whole MultimodalGPT2 forward for one batch row-block
# --------------------------------------------------------------------------

def _fused_forward_kernel(*refs, n_layer, n_head, seq_len, d_head, n_embd,
                          eps, has_audio):
    (h0_ref, ln1_g, ln1_b, caw, cab, apw, apb, ln2_g, ln2_b,
     fcw, fcb, fpw, fpb, lnfg, lnfb, wte) = refs[:16]
    if has_audio:
        (aud, apj_w, apj_b, xv_w, xv_b, xo_w, xo_b, plg, plb) = refs[16:25]
    logits_ref = refs[-1]

    f32 = jnp.float32
    bf16 = jnp.bfloat16
    E, Dh, S = n_embd, d_head, seq_len

    def layernorm(x, g, b):                       # f32 statistics
        mu = jnp.mean(x, axis=-1, keepdims=True)
        var = jnp.mean(jnp.square(x - mu), axis=-1, keepdims=True)
        return (x - mu) * jax.lax.rsqrt(var + eps) * g + b

    def gelu_new(x):                              # HF GPT-2 tanh approximation
        c = math.sqrt(2.0 / math.pi)
        return 0.5 * x * (1.0 + jnp.tanh(c * (x + 0.044715 * x * x * x)))

    def mm(a, w):                                 # bf16 MXU operands, f32 acc
        return jnp.dot(a.astype(bf16), w, preferred_element_type=f32)

    # causal mask generated in-kernel (one batch per grid step -> plain causal)
    row = jax.lax.broadcasted_iota(jnp.int32, (S, S), 0)
    col = jax.lax.broadcasted_iota(jnp.int32, (S, S), 1)
    causal = col <= row

    h = h0_ref[...]                               # (S, E) f32, stays in vregs

    # --- GPT-2 transformer blocks (pre-LN) --------------------------------
    for l in range(n_layer):
        ln1 = layernorm(h, ln1_g[l], ln1_b[l])
        qkv = mm(ln1, caw[l]) + cab[l]            # (S, 3E); Q pre-scaled
        heads = []
        for hd in range(n_head):
            q = qkv[:, hd * Dh:(hd + 1) * Dh]                 # (S, Dh)
            k = qkv[:, E + hd * Dh:E + (hd + 1) * Dh]
            v = qkv[:, 2 * E + hd * Dh:2 * E + (hd + 1) * Dh]
            s = jax.lax.dot_general(q, k, (((1,), (1,)), ((), ())),
                                    preferred_element_type=f32)   # (S, S)
            s = jnp.where(causal, s, -1e30)
            s = s - jnp.max(s, axis=-1, keepdims=True)
            p = jnp.exp(s)
            p = p * pl.reciprocal(jnp.sum(p, axis=-1, keepdims=True),
                                  approx=True)
            heads.append(jnp.dot(p, v, preferred_element_type=f32))  # (S, Dh)
        attn = jnp.concatenate(heads, axis=-1)                       # (S, E)
        h = h + mm(attn, apw[l]) + apb[l]                            # residual

        ln2 = layernorm(h, ln2_g[l], ln2_b[l])
        ff = gelu_new(mm(ln2, fcw[l]) + fcb[l])                      # (S, 4E)
        h = h + mm(ff, fpw[l]) + fpb[l]                              # residual

    h = layernorm(h, lnfg[...], lnfb[...])                           # ln_f

    # --- audio cross-attention (single key -> softmax == 1 exactly) -------
    if has_audio:
        a = mm(aud[...], apj_w[...]) + apj_b[...]     # (S, E) (rows identical)
        xv = mm(a, xv_w[...]) + xv_b[...]             # value projection
        xo = mm(xv, xo_w[...]) + xo_b[...]            # out projection
        h = h + xo
        h = layernorm(h, plg[...], plb[...])

    # --- lm_head (tied wte): h @ wte^T, lane-dense padded vocab store -----
    logits_ref[...] = jax.lax.dot_general(h.astype(bf16), wte[...],
                                          (((1,), (1,)), ((), ())),
                                          preferred_element_type=f32)


# --------------------------------------------------------------------------
# Parameters (synthetic, deterministic)
# --------------------------------------------------------------------------

def init_params(key, cfg):
    E, L = cfg.n_embd, cfg.n_layer

    def normal(k, shape, std=0.02):
        return std * jax.random.normal(k, shape, dtype=jnp.float32)

    ks = iter(jax.random.split(key, 16))
    return dict(
        wte=normal(next(ks), (cfg.vocab_size, E)),
        wpe=normal(next(ks), (cfg.n_positions, E)),
        ln_f_g=jnp.ones((1, E), jnp.float32),
        ln_f_b=jnp.zeros((1, E), jnp.float32),
        blocks=dict(
            ln1_g=jnp.ones((L, 1, E), jnp.float32),
            ln1_b=jnp.zeros((L, 1, E), jnp.float32),
            c_attn_w=normal(next(ks), (L, E, 3 * E)),
            c_attn_b=jnp.zeros((L, 1, 3 * E), jnp.float32),
            attn_proj_w=normal(next(ks), (L, E, E)),
            attn_proj_b=jnp.zeros((L, 1, E), jnp.float32),
            ln2_g=jnp.ones((L, 1, E), jnp.float32),
            ln2_b=jnp.zeros((L, 1, E), jnp.float32),
            c_fc_w=normal(next(ks), (L, E, 4 * E)),
            c_fc_b=jnp.zeros((L, 1, 4 * E), jnp.float32),
            c_proj_w=normal(next(ks), (L, 4 * E, E)),
            c_proj_b=jnp.zeros((L, 1, E), jnp.float32),
        ),
        xattn=dict(
            audio_proj_w=normal(next(ks), (cfg.audio_dim, E)),
            audio_proj_b=jnp.zeros((1, E), jnp.float32),
            # q/k projections of the 1-key cross-attention are mathematically
            # inert (softmax over a single key == 1); only value/out are used.
            wv=normal(next(ks), (E, E)),
            bv=jnp.zeros((1, E), jnp.float32),
            out_w=normal(next(ks), (E, E)),
            out_b=jnp.zeros((1, E), jnp.float32),
            post_ln_g=jnp.ones((1, E), jnp.float32),
            post_ln_b=jnp.zeros((1, E), jnp.float32),
        ),
    )


# --------------------------------------------------------------------------
# Forward wrapper: embedding gather + layout plumbing + one pallas_call
# --------------------------------------------------------------------------

def _round_up(x, m):
    return ((x + m - 1) // m) * m


@functools.partial(jax.jit, static_argnames=("cfg",))
def multimodal_gpt2_forward(params, input_ids, audio_embeddings=None,
                            attention_mask=None, *, cfg):
    # TODO(synk): attention_mask (padding) handling not implemented; only
    # attention_mask=None is supported.
    del attention_mask
    B, S = input_ids.shape
    E, H, L = cfg.n_embd, cfg.n_head, cfg.n_layer
    Dh = E // H
    V = cfg.vocab_size
    Vpad = _round_up(V, 128)          # lane-dense, unmasked logits store
    M = B * S
    scale = 1.0 / math.sqrt(Dh)
    bf16 = jnp.bfloat16

    # token + position embeddings (gather is glue, stays in plain JAX)
    h0 = (params["wte"][input_ids] + params["wpe"][:S][None, :, :]).reshape(M, E)

    blk = params["blocks"]
    # fold 1/sqrt(Dh) into the Q third of fused c_attn (trace-time, weight-side)
    caw = blk["c_attn_w"].at[:, :, :E].multiply(scale).astype(bf16)
    cab = blk["c_attn_b"].at[:, :, :E].multiply(scale)

    # tied lm_head weight, zero-padded in the vocab dim, bf16 MXU operand
    wte_pad = jnp.pad(params["wte"], ((0, Vpad - V), (0, 0))).astype(bf16)

    has_audio = audio_embeddings is not None

    inputs = [
        h0,
        blk["ln1_g"], blk["ln1_b"], caw, cab,
        blk["attn_proj_w"].astype(bf16), blk["attn_proj_b"],
        blk["ln2_g"], blk["ln2_b"],
        blk["c_fc_w"].astype(bf16), blk["c_fc_b"],
        blk["c_proj_w"].astype(bf16), blk["c_proj_b"],
        params["ln_f_g"], params["ln_f_b"],
        wte_pad,
    ]

    def full_spec(x):                         # resident, constant across grid
        nd = x.ndim
        return pl.BlockSpec(x.shape, lambda b, _nd=nd: (0,) * _nd)

    in_specs = [pl.BlockSpec((S, E), lambda b: (b, 0))] + \
               [full_spec(x) for x in inputs[1:]]

    if has_audio:
        xa = params["xattn"]
        # one audio token per batch element, replicated over its S positions
        audio_rep = jnp.repeat(audio_embeddings, S, axis=0)        # (M, A)
        aud_inputs = [
            audio_rep,
            xa["audio_proj_w"].astype(bf16), xa["audio_proj_b"],
            xa["wv"].astype(bf16), xa["bv"],
            xa["out_w"].astype(bf16), xa["out_b"],
            xa["post_ln_g"], xa["post_ln_b"],
        ]
        inputs += aud_inputs
        in_specs += [pl.BlockSpec((S, cfg.audio_dim), lambda b: (b, 0))] + \
                    [full_spec(x) for x in aud_inputs[1:]]

    kern = functools.partial(
        _fused_forward_kernel,
        n_layer=L, n_head=H, seq_len=S, d_head=Dh, n_embd=E,
        eps=float(cfg.layer_norm_epsilon), has_audio=has_audio)

    # Batch axis on the grid, marked "parallel" (v7x: shards across both TCs).
    logits_pad = pl.pallas_call(
        kern,
        out_shape=jax.ShapeDtypeStruct((M, Vpad), jnp.float32),
        grid=(B,),
        in_specs=in_specs,
        out_specs=pl.BlockSpec((S, Vpad), lambda b: (b, 0)),
        compiler_params=pltpu.CompilerParams(
            dimension_semantics=("parallel",)),
    )(*inputs)

    return {"logits": logits_pad[:, :V].reshape(B, S, V)}


# --------------------------------------------------------------------------

if __name__ == "__main__":
    cfg = Config()
    key = jax.random.PRNGKey(0)
    kp, ki, ka = jax.random.split(key, 3)

    params = init_params(kp, cfg)

    B, S = 2, 8
    input_ids = jax.random.randint(ki, (B, S), 0, cfg.vocab_size, dtype=jnp.int32)
    audio_embeddings = jax.random.normal(ka, (B, cfg.audio_dim), dtype=jnp.float32)

    out = multimodal_gpt2_forward(params, input_ids, audio_embeddings, cfg=cfg)
    logits = jax.block_until_ready(out["logits"])
    assert logits.shape == (B, S, cfg.vocab_size)
    assert bool(jnp.all(jnp.isfinite(logits)))

    # text-only path (audio inputs dropped from the pallas_call entirely)
    out2 = multimodal_gpt2_forward(params, input_ids, None, cfg=cfg)
    jax.block_until_ready(out2["logits"])

    print("KERNEL_OK")
</pallas_src>

<mosaic_0001>
module attributes {stable_mosaic.version = 11 : i64} {
  func.func @_fused_forward_kernel(%arg0: i32, %arg1: memref<8x32xf32, #tpu.memory_space<vmem>>, %arg2: memref<2x1x32xf32, #tpu.memory_space<vmem>>, %arg3: memref<2x1x32xf32, #tpu.memory_space<vmem>>, %arg4: memref<2x32x96xbf16, #tpu.memory_space<vmem>>, %arg5: memref<2x1x96xf32, #tpu.memory_space<vmem>>, %arg6: memref<2x32x32xbf16, #tpu.memory_space<vmem>>, %arg7: memref<2x1x32xf32, #tpu.memory_space<vmem>>, %arg8: memref<2x1x32xf32, #tpu.memory_space<vmem>>, %arg9: memref<2x1x32xf32, #tpu.memory_space<vmem>>, %arg10: memref<2x32x128xbf16, #tpu.memory_space<vmem>>, %arg11: memref<2x1x128xf32, #tpu.memory_space<vmem>>, %arg12: memref<2x128x32xbf16, #tpu.memory_space<vmem>>, %arg13: memref<2x1x32xf32, #tpu.memory_space<vmem>>, %arg14: memref<1x32xf32, #tpu.memory_space<vmem>>, %arg15: memref<1x32xf32, #tpu.memory_space<vmem>>, %arg16: memref<128x32xbf16, #tpu.memory_space<vmem>>, %arg17: memref<8x16xf32, #tpu.memory_space<vmem>>, %arg18: memref<16x32xbf16, #tpu.memory_space<vmem>>, %arg19: memref<1x32xf32, #tpu.memory_space<vmem>>, %arg20: memref<32x32xbf16, #tpu.memory_space<vmem>>, %arg21: memref<1x32xf32, #tpu.memory_space<vmem>>, %arg22: memref<32x32xbf16, #tpu.memory_space<vmem>>, %arg23: memref<1x32xf32, #tpu.memory_space<vmem>>, %arg24: memref<1x32xf32, #tpu.memory_space<vmem>>, %arg25: memref<1x32xf32, #tpu.memory_space<vmem>>, %arg26: memref<8x128xf32, #tpu.memory_space<vmem>>) attributes {dimension_semantics = [#tpu.dimension_semantics<parallel>], iteration_bounds = array<i64: 2>, scalar_prefetch = 0 : i64, scratch_operands = 0 : i64, tpu.core_type = #tpu.core_type<tc>, window_params = [{transform_indices = @transform_0, window_bounds = array<i64: 8, 32>}, {pipeline_mode = #tpu.pipeline_mode<synchronous>, transform_indices = @transform_1, window_bounds = array<i64: 2, 1, 32>}, {pipeline_mode = #tpu.pipeline_mode<synchronous>, transform_indices = @transform_2, window_bounds = array<i64: 2, 1, 32>}, {pipeline_mode = #tpu.pipeline_mode<synchronous>, transform_indices = @transform_3, window_bounds = array<i64: 2, 32, 96>}, {pipeline_mode = #tpu.pipeline_mode<synchronous>, transform_indices = @transform_4, window_bounds = array<i64: 2, 1, 96>}, {pipeline_mode = #tpu.pipeline_mode<synchronous>, transform_indices = @transform_5, window_bounds = array<i64: 2, 32, 32>}, {pipeline_mode = #tpu.pipeline_mode<synchronous>, transform_indices = @transform_6, window_bounds = array<i64: 2, 1, 32>}, {pipeline_mode = #tpu.pipeline_mode<synchronous>, transform_indices = @transform_7, window_bounds = array<i64: 2, 1, 32>}, {pipeline_mode = #tpu.pipeline_mode<synchronous>, transform_indices = @transform_8, window_bounds = array<i64: 2, 1, 32>}, {pipeline_mode = #tpu.pipeline_mode<synchronous>, transform_indices = @transform_9, window_bounds = array<i64: 2, 32, 128>}, {pipeline_mode = #tpu.pipeline_mode<synchronous>, transform_indices = @transform_10, window_bounds = array<i64: 2, 1, 128>}, {pipeline_mode = #tpu.pipeline_mode<synchronous>, transform_indices = @transform_11, window_bounds = array<i64: 2, 128, 32>}, {pipeline_mode = #tpu.pipeline_mode<synchronous>, transform_indices = @transform_12, window_bounds = array<i64: 2, 1, 32>}, {pipeline_mode = #tpu.pipeline_mode<synchronous>, transform_indices = @transform_13, window_bounds = array<i64: 1, 32>}, {pipeline_mode = #tpu.pipeline_mode<synchronous>, transform_indices = @transform_14, window_bounds = array<i64: 1, 32>}, {pipeline_mode = #tpu.pipeline_mode<synchronous>, transform_indices = @transform_15, window_bounds = array<i64: 128, 32>}, {transform_indices = @transform_16, window_bounds = array<i64: 8, 16>}, {pipeline_mode = #tpu.pipeline_mode<synchronous>, transform_indices = @transform_17, window_bounds = array<i64: 16, 32>}, {pipeline_mode = #tpu.pipeline_mode<synchronous>, transform_indices = @transform_18, window_bounds = array<i64: 1, 32>}, {pipeline_mode = #tpu.pipeline_mode<synchronous>, transform_indices = @transform_19, window_bounds = array<i64: 32, 32>}, {pipeline_mode = #tpu.pipeline_mode<synchronous>, transform_indices = @transform_20, window_bounds = array<i64: 1, 32>}, {pipeline_mode = #tpu.pipeline_mode<synchronous>, transform_indices = @transform_21, window_bounds = array<i64: 32, 32>}, {pipeline_mode = #tpu.pipeline_mode<synchronous>, transform_indices = @transform_22, window_bounds = array<i64: 1, 32>}, {pipeline_mode = #tpu.pipeline_mode<synchronous>, transform_indices = @transform_23, window_bounds = array<i64: 1, 32>}, {pipeline_mode = #tpu.pipeline_mode<synchronous>, transform_indices = @transform_24, window_bounds = array<i64: 1, 32>}, {transform_indices = @transform_25, window_bounds = array<i64: 8, 128>}]} {
    %0 = tpu.iota {dimensions = array<i32: 0>} : vector<8x8xi32>
    %1 = tpu.iota {dimensions = array<i32: 1>} : vector<8x8xi32>
    %2 = arith.cmpi sle, %1, %0 : vector<8x8xi32>
    %c0 = arith.constant 0 : index
    %c0_0 = arith.constant 0 : index
    %3 = vector.load %arg1[%c0, %c0_0] : memref<8x32xf32, #tpu.memory_space<vmem>>, vector<8x32xf32>
    %c0_1 = arith.constant 0 : index
    %c0_2 = arith.constant 0 : index
    %c0_3 = arith.constant 0 : index
    %4 = vector.load %arg2[%c0_1, %c0_2, %c0_3] : memref<2x1x32xf32, #tpu.memory_space<vmem>>, vector<1x1x32xf32>
    %5 = vector.shape_cast %4 : vector<1x1x32xf32> to vector<1x32xf32>
    %c0_4 = arith.constant 0 : index
    %c0_5 = arith.constant 0 : index
    %c0_6 = arith.constant 0 : index
    %6 = vector.load %arg3[%c0_4, %c0_5, %c0_6] : memref<2x1x32xf32, #tpu.memory_space<vmem>>, vector<1x1x32xf32>
    %7 = vector.shape_cast %6 : vector<1x1x32xf32> to vector<1x32xf32>
    %cst = arith.constant dense<0.000000e+00> : vector<8xf32>
    %8 = vector.multi_reduction <add>, %3, %cst [1] : vector<8x32xf32> to vector<8xf32>
    %9 = vector.shape_cast %8 : vector<8xf32> to vector<8x1xf32>
    %cst_7 = arith.constant 3.200000e+01 : f32
    %10 = vector.broadcast %cst_7 : f32 to vector<8x1xf32>
    %11 = arith.divf %9, %10 : vector<8x1xf32>
    %12 = vector.broadcast %11 : vector<8x1xf32> to vector<8x32xf32>
    %13 = arith.subf %3, %12 : vector<8x32xf32>
    %14 = arith.mulf %13, %13 : vector<8x32xf32>
    %cst_8 = arith.constant dense<0.000000e+00> : vector<8xf32>
    %15 = vector.multi_reduction <add>, %14, %cst_8 [1] : vector<8x32xf32> to vector<8xf32>
    %16 = vector.shape_cast %15 : vector<8xf32> to vector<8x1xf32>
    %cst_9 = arith.constant 3.200000e+01 : f32
    %17 = vector.broadcast %cst_9 : f32 to vector<8x1xf32>
    %18 = arith.divf %16, %17 : vector<8x1xf32>
    %19 = vector.broadcast %11 : vector<8x1xf32> to vector<8x32xf32>
    %20 = arith.subf %3, %19 : vector<8x32xf32>
    %cst_10 = arith.constant 9.99999974E-6 : f32
    %21 = vector.broadcast %cst_10 : f32 to vector<8x1xf32>
    %22 = arith.addf %18, %21 : vector<8x1xf32>
    %23 = math.rsqrt %22 : vector<8x1xf32>
    %24 = vector.broadcast %23 : vector<8x1xf32> to vector<8x32xf32>
    %25 = arith.mulf %20, %24 : vector<8x32xf32>
    %26 = vector.broadcast %5 : vector<1x32xf32> to vector<8x32xf32>
    %27 = arith.mulf %25, %26 : vector<8x32xf32>
    %28 = vector.broadcast %7 : vector<1x32xf32> to vector<8x32xf32>
    %29 = arith.addf %27, %28 : vector<8x32xf32>
    %c0_11 = arith.constant 0 : index
    %c0_12 = arith.constant 0 : index
    %c0_13 = arith.constant 0 : index
    %30 = vector.load %arg4[%c0_11, %c0_12, %c0_13] : memref<2x32x96xbf16, #tpu.memory_space<vmem>>, vector<1x32x96xbf16>
    %31 = vector.shape_cast %30 : vector<1x32x96xbf16> to vector<32x96xbf16>
    %32 = arith.truncf %29 : vector<8x32xf32> to vector<8x32xbf16>
    %cst_14 = arith.constant dense<0.000000e+00> : vector<8x96xf32>
    %33 = tpu.matmul %32, %31, %cst_14 {dimension_numbers = #tpu.dot_dimension_numbers<[1], [0], [0], [1], [0, 0, 1, 1], [], []>} : vector<8x32xbf16>, vector<32x96xbf16>, vector<8x96xf32> -> vector<8x96xf32>
    %c0_15 = arith.constant 0 : index
    %c0_16 = arith.constant 0 : index
    %c0_17 = arith.constant 0 : index
    %34 = vector.load %arg5[%c0_15, %c0_16, %c0_17] : memref<2x1x96xf32, #tpu.memory_space<vmem>>, vector<1x1x96xf32>
    %35 = vector.shape_cast %34 : vector<1x1x96xf32> to vector<1x96xf32>
    %36 = vector.broadcast %35 : vector<1x96xf32> to vector<8x96xf32>
    %37 = arith.addf %33, %36 : vector<8x96xf32>
    %38 = vector.extract_strided_slice %37 {offsets = [0, 0], sizes = [8, 8], strides = [1, 1]} : vector<8x96xf32> to vector<8x8xf32>
    %39 = vector.extract_strided_slice %37 {offsets = [0, 32], sizes = [8, 8], strides = [1, 1]} : vector<8x96xf32> to vector<8x8xf32>
    %40 = vector.extract_strided_slice %37 {offsets = [0, 64], sizes = [8, 8], strides = [1, 1]} : vector<8x96xf32> to vector<8x8xf32>
    %cst_18 = arith.constant dense<0.000000e+00> : vector<8x8xf32>
    %41 = tpu.matmul %38, %39, %cst_18 {dimension_numbers = #tpu.dot_dimension_numbers<[1], [1], [0], [0], [0, 0, 1, 0], [], []>} : vector<8x8xf32>, vector<8x8xf32>, vector<8x8xf32> -> vector<8x8xf32>
    %cst_19 = arith.constant -1.000000e+30 : f32
    %42 = vector.broadcast %cst_19 : f32 to vector<8x8xf32>
    %43 = arith.select %2, %41, %42 : vector<8x8xi1>, vector<8x8xf32>
    %cst_20 = arith.constant dense<0xFF800000> : vector<8xf32>
    %44 = vector.multi_reduction <maximumf>, %43, %cst_20 [1] : vector<8x8xf32> to vector<8xf32>
    %45 = vector.shape_cast %44 : vector<8xf32> to vector<8x1xf32>
    %46 = vector.broadcast %45 : vector<8x1xf32> to vector<8x8xf32>
    %47 = arith.subf %43, %46 : vector<8x8xf32>
    %48 = math.exp %47 : vector<8x8xf32>
    %cst_21 = arith.constant dense<0.000000e+00> : vector<8xf32>
    %49 = vector.multi_reduction <add>, %48, %cst_21 [1] : vector<8x8xf32> to vector<8xf32>
    %50 = vector.shape_cast %49 : vector<8xf32> to vector<8x1xf32>
    %51 = tpu.reciprocal %50 {approx = true} : vector<8x1xf32> -> vector<8x1xf32>
    %52 = vector.broadcast %51 : vector<8x1xf32> to vector<8x8xf32>
    %53 = arith.mulf %48, %52 : vector<8x8xf32>
    %cst_22 = arith.constant dense<0.000000e+00> : vector<8x8xf32>
    %54 = tpu.matmul %53, %40, %cst_22 {dimension_numbers = #tpu.dot_dimension_numbers<[1], [0], [0], [1], [0, 0, 1, 1], [], []>} : vector<8x8xf32>, vector<8x8xf32>, vector<8x8xf32> -> vector<8x8xf32>
    %55 = vector.extract_strided_slice %37 {offsets = [0, 8], sizes = [8, 8], strides = [1, 1]} : vector<8x96xf32> to vector<8x8xf32>
    %56 = vector.extract_strided_slice %37 {offsets = [0, 40], sizes = [8, 8], strides = [1, 1]} : vector<8x96xf32> to vector<8x8xf32>
    %57 = vector.extract_strided_slice %37 {offsets = [0, 72], sizes = [8, 8], strides = [1, 1]} : vector<8x96xf32> to vector<8x8xf32>
    %cst_23 = arith.constant dense<0.000000e+00> : vector<8x8xf32>
    %58 = tpu.matmul %55, %56, %cst_23 {dimension_numbers = #tpu.dot_dimension_numbers<[1], [1], [0], [0], [0, 0, 1, 0], [], []>} : vector<8x8xf32>, vector<8x8xf32>, vector<8x8xf32> -> vector<8x8xf32>
    %cst_24 = arith.constant -1.000000e+30 : f32
    %59 = vector.broadcast %cst_24 : f32 to vector<8x8xf32>
    %60 = arith.select %2, %58, %59 : vector<8x8xi1>, vector<8x8xf32>
    %cst_25 = arith.constant dense<0xFF800000> : vector<8xf32>
    %61 = vector.multi_reduction <maximumf>, %60, %cst_25 [1] : vector<8x8xf32> to vector<8xf32>
    %62 = vector.shape_cast %61 : vector<8xf32> to vector<8x1xf32>
    %63 = vector.broadcast %62 : vector<8x1xf32> to vector<8x8xf32>
    %64 = arith.subf %60, %63 : vector<8x8xf32>
    %65 = math.exp %64 : vector<8x8xf32>
    %cst_26 = arith.constant dense<0.000000e+00> : vector<8xf32>
    %66 = vector.multi_reduction <add>, %65, %cst_26 [1] : vector<8x8xf32> to vector<8xf32>
    %67 = vector.shape_cast %66 : vector<8xf32> to vector<8x1xf32>
    %68 = tpu.reciprocal %67 {approx = true} : vector<8x1xf32> -> vector<8x1xf32>
    %69 = vector.broadcast %68 : vector<8x1xf32> to vector<8x8xf32>
    %70 = arith.mulf %65, %69 : vector<8x8xf32>
    %cst_27 = arith.constant dense<0.000000e+00> : vector<8x8xf32>
    %71 = tpu.matmul %70, %57, %cst_27 {dimension_numbers = #tpu.dot_dimension_numbers<[1], [0], [0], [1], [0, 0, 1, 1], [], []>} : vector<8x8xf32>, vector<8x8xf32>, vector<8x8xf32> -> vector<8x8xf32>
    %72 = vector.extract_strided_slice %37 {offsets = [0, 16], sizes = [8, 8], strides = [1, 1]} : vector<8x96xf32> to vector<8x8xf32>
    %73 = vector.extract_strided_slice %37 {offsets = [0, 48], sizes = [8, 8], strides = [1, 1]} : vector<8x96xf32> to vector<8x8xf32>
    %74 = vector.extract_strided_slice %37 {offsets = [0, 80], sizes = [8, 8], strides = [1, 1]} : vector<8x96xf32> to vector<8x8xf32>
    %cst_28 = arith.constant dense<0.000000e+00> : vector<8x8xf32>
    %75 = tpu.matmul %72, %73, %cst_28 {dimension_numbers = #tpu.dot_dimension_numbers<[1], [1], [0], [0], [0, 0, 1, 0], [], []>} : vector<8x8xf32>, vector<8x8xf32>, vector<8x8xf32> -> vector<8x8xf32>
    %cst_29 = arith.constant -1.000000e+30 : f32
    %76 = vector.broadcast %cst_29 : f32 to vector<8x8xf32>
    %77 = arith.select %2, %75, %76 : vector<8x8xi1>, vector<8x8xf32>
    %cst_30 = arith.constant dense<0xFF800000> : vector<8xf32>
    %78 = vector.multi_reduction <maximumf>, %77, %cst_30 [1] : vector<8x8xf32> to vector<8xf32>
    %79 = vector.shape_cast %78 : vector<8xf32> to vector<8x1xf32>
    %80 = vector.broadcast %79 : vector<8x1xf32> to vector<8x8xf32>
    %81 = arith.subf %77, %80 : vector<8x8xf32>
    %82 = math.exp %81 : vector<8x8xf32>
    %cst_31 = arith.constant dense<0.000000e+00> : vector<8xf32>
    %83 = vector.multi_reduction <add>, %82, %cst_31 [1] : vector<8x8xf32> to vector<8xf32>
    %84 = vector.shape_cast %83 : vector<8xf32> to vector<8x1xf32>
    %85 = tpu.reciprocal %84 {approx = true} : vector<8x1xf32> -> vector<8x1xf32>
    %86 = vector.broadcast %85 : vector<8x1xf32> to vector<8x8xf32>
    %87 = arith.mulf %82, %86 : vector<8x8xf32>
    %cst_32 = arith.constant dense<0.000000e+00> : vector<8x8xf32>
    %88 = tpu.matmul %87, %74, %cst_32 {dimension_numbers = #tpu.dot_dimension_numbers<[1], [0], [0], [1], [0, 0, 1, 1], [], []>} : vector<8x8xf32>, vector<8x8xf32>, vector<8x8xf32> -> vector<8x8xf32>
    %89 = vector.extract_strided_slice %37 {offsets = [0, 24], sizes = [8, 8], strides = [1, 1]} : vector<8x96xf32> to vector<8x8xf32>
    %90 = vector.extract_strided_slice %37 {offsets = [0, 56], sizes = [8, 8], strides = [1, 1]} : vector<8x96xf32> to vector<8x8xf32>
    %91 = vector.extract_strided_slice %37 {offsets = [0, 88], sizes = [8, 8], strides = [1, 1]} : vector<8x96xf32> to vector<8x8xf32>
    %cst_33 = arith.constant dense<0.000000e+00> : vector<8x8xf32>
    %92 = tpu.matmul %89, %90, %cst_33 {dimension_numbers = #tpu.dot_dimension_numbers<[1], [1], [0], [0], [0, 0, 1, 0], [], []>} : vector<8x8xf32>, vector<8x8xf32>, vector<8x8xf32> -> vector<8x8xf32>
    %cst_34 = arith.constant -1.000000e+30 : f32
    %93 = vector.broadcast %cst_34 : f32 to vector<8x8xf32>
    %94 = arith.select %2, %92, %93 : vector<8x8xi1>, vector<8x8xf32>
    %cst_35 = arith.constant dense<0xFF800000> : vector<8xf32>
    %95 = vector.multi_reduction <maximumf>, %94, %cst_35 [1] : vector<8x8xf32> to vector<8xf32>
    %96 = vector.shape_cast %95 : vector<8xf32> to vector<8x1xf32>
    %97 = vector.broadcast %96 : vector<8x1xf32> to vector<8x8xf32>
    %98 = arith.subf %94, %97 : vector<8x8xf32>
    %99 = math.exp %98 : vector<8x8xf32>
    %cst_36 = arith.constant dense<0.000000e+00> : vector<8xf32>
    %100 = vector.multi_reduction <add>, %99, %cst_36 [1] : vector<8x8xf32> to vector<8xf32>
    %101 = vector.shape_cast %100 : vector<8xf32> to vector<8x1xf32>
    %102 = tpu.reciprocal %101 {approx = true} : vector<8x1xf32> -> vector<8x1xf32>
    %103 = vector.broadcast %102 : vector<8x1xf32> to vector<8x8xf32>
    %104 = arith.mulf %99, %103 : vector<8x8xf32>
    %cst_37 = arith.constant dense<0.000000e+00> : vector<8x8xf32>
    %105 = tpu.matmul %104, %91, %cst_37 {dimension_numbers = #tpu.dot_dimension_numbers<[1], [0], [0], [1], [0, 0, 1, 1], [], []>} : vector<8x8xf32>, vector<8x8xf32>, vector<8x8xf32> -> vector<8x8xf32>
    %106 = tpu.concatenate %54, %71, %88, %105 in 1 : vector<8x8xf32>, vector<8x8xf32>, vector<8x8xf32>, vector<8x8xf32> -> vector<8x32xf32>
    %c0_38 = arith.constant 0 : index
    %c0_39 = arith.constant 0 : index
    %c0_40 = arith.constant 0 : index
    %107 = vector.load %arg6[%c0_38, %c0_39, %c0_40] : memref<2x32x32xbf16, #tpu.memory_space<vmem>>, vector<1x32x32xbf16>
    %108 = vector.shape_cast %107 : vector<1x32x32xbf16> to vector<32x32xbf16>
    %109 = arith.truncf %106 : vector<8x32xf32> to vector<8x32xbf16>
    %cst_41 = arith.constant dense<0.000000e+00> : vector<8x32xf32>
    %110 = tpu.matmul %109, %108, %cst_41 {dimension_numbers = #tpu.dot_dimension_numbers<[1], [0], [0], [1], [0, 0, 1, 1], [], []>} : vector<8x32xbf16>, vector<32x32xbf16>, vector<8x32xf32> -> vector<8x32xf32>
    %111 = arith.addf %3, %110 : vector<8x32xf32>
    %c0_42 = arith.constant 0 : index
    %c0_43 = arith.constant 0 : index
    %c0_44 = arith.constant 0 : index
    %112 = vector.load %arg7[%c0_42, %c0_43, %c0_44] : memref<2x1x32xf32, #tpu.memory_space<vmem>>, vector<1x1x32xf32>
    %113 = vector.shape_cast %112 : vector<1x1x32xf32> to vector<1x32xf32>
    %114 = vector.broadcast %113 : vector<1x32xf32> to vector<8x32xf32>
    %115 = arith.addf %111, %114 : vector<8x32xf32>
    %c0_45 = arith.constant 0 : index
    %c0_46 = arith.constant 0 : index
    %c0_47 = arith.constant 0 : index
    %116 = vector.load %arg8[%c0_45, %c0_46, %c0_47] : memref<2x1x32xf32, #tpu.memory_space<vmem>>, vector<1x1x32xf32>
    %117 = vector.shape_cast %116 : vector<1x1x32xf32> to vector<1x32xf32>
    %c0_48 = arith.constant 0 : index
    %c0_49 = arith.constant 0 : index
    %c0_50 = arith.constant 0 : index
    %118 = vector.load %arg9[%c0_48, %c0_49, %c0_50] : memref<2x1x32xf32, #tpu.memory_space<vmem>>, vector<1x1x32xf32>
    %119 = vector.shape_cast %118 : vector<1x1x32xf32> to vector<1x32xf32>
    %cst_51 = arith.constant dense<0.000000e+00> : vector<8xf32>
    %120 = vector.multi_reduction <add>, %115, %cst_51 [1] : vector<8x32xf32> to vector<8xf32>
    %121 = vector.shape_cast %120 : vector<8xf32> to vector<8x1xf32>
    %cst_52 = arith.constant 3.200000e+01 : f32
    %122 = vector.broadcast %cst_52 : f32 to vector<8x1xf32>
    %123 = arith.divf %121, %122 : vector<8x1xf32>
    %124 = vector.broadcast %123 : vector<8x1xf32> to vector<8x32xf32>
    %125 = arith.subf %115, %124 : vector<8x32xf32>
    %126 = arith.mulf %125, %125 : vector<8x32xf32>
    %cst_53 = arith.constant dense<0.000000e+00> : vector<8xf32>
    %127 = vector.multi_reduction <add>, %126, %cst_53 [1] : vector<8x32xf32> to vector<8xf32>
    %128 = vector.shape_cast %127 : vector<8xf32> to vector<8x1xf32>
    %cst_54 = arith.constant 3.200000e+01 : f32
    %129 = vector.broadcast %cst_54 : f32 to vector<8x1xf32>
    %130 = arith.divf %128, %129 : vector<8x1xf32>
    %131 = vector.broadcast %123 : vector<8x1xf32> to vector<8x32xf32>
    %132 = arith.subf %115, %131 : vector<8x32xf32>
    %cst_55 = arith.constant 9.99999974E-6 : f32
    %133 = vector.broadcast %cst_55 : f32 to vector<8x1xf32>
    %134 = arith.addf %130, %133 : vector<8x1xf32>
    %135 = math.rsqrt %134 : vector<8x1xf32>
    %136 = vector.broadcast %135 : vector<8x1xf32> to vector<8x32xf32>
    %137 = arith.mulf %132, %136 : vector<8x32xf32>
    %138 = vector.broadcast %117 : vector<1x32xf32> to vector<8x32xf32>
    %139 = arith.mulf %137, %138 : vector<8x32xf32>
    %140 = vector.broadcast %119 : vector<1x32xf32> to vector<8x32xf32>
    %141 = arith.addf %139, %140 : vector<8x32xf32>
    %c0_56 = arith.constant 0 : index
    %c0_57 = arith.constant 0 : index
    %c0_58 = arith.constant 0 : index
    %142 = vector.load %arg10[%c0_56, %c0_57, %c0_58] : memref<2x32x128xbf16, #tpu.memory_space<vmem>>, vector<1x32x128xbf16>
    %143 = vector.shape_cast %142 : vector<1x32x128xbf16> to vector<32x128xbf16>
    %144 = arith.truncf %141 : vector<8x32xf32> to vector<8x32xbf16>
    %cst_59 = arith.constant dense<0.000000e+00> : vector<8x128xf32>
    %145 = tpu.matmul %144, %143, %cst_59 {dimension_numbers = #tpu.dot_dimension_numbers<[1], [0], [0], [1], [0, 0, 1, 1], [], []>} : vector<8x32xbf16>, vector<32x128xbf16>, vector<8x128xf32> -> vector<8x128xf32>
    %c0_60 = arith.constant 0 : index
    %c0_61 = arith.constant 0 : index
    %c0_62 = arith.constant 0 : index
    %146 = vector.load %arg11[%c0_60, %c0_61, %c0_62] : memref<2x1x128xf32, #tpu.memory_space<vmem>>, vector<1x1x128xf32>
    %147 = vector.shape_cast %146 : vector<1x1x128xf32> to vector<1x128xf32>
    %148 = vector.broadcast %147 : vector<1x128xf32> to vector<8x128xf32>
    %149 = arith.addf %145, %148 : vector<8x128xf32>
    %cst_63 = arith.constant 5.000000e-01 : f32
    %150 = vector.broadcast %cst_63 : f32 to vector<8x128xf32>
    %151 = arith.mulf %150, %149 : vector<8x128xf32>
    %cst_64 = arith.constant 4.471500e-02 : f32
    %152 = vector.broadcast %cst_64 : f32 to vector<8x128xf32>
    %153 = arith.mulf %152, %149 : vector<8x128xf32>
    %154 = arith.mulf %153, %149 : vector<8x128xf32>
    %155 = arith.mulf %154, %149 : vector<8x128xf32>
    %156 = arith.addf %149, %155 : vector<8x128xf32>
    %cst_65 = arith.constant 0.797884583 : f32
    %157 = vector.broadcast %cst_65 : f32 to vector<8x128xf32>
    %158 = arith.mulf %157, %156 : vector<8x128xf32>
    %159 = math.tanh %158 : vector<8x128xf32>
    %cst_66 = arith.constant 1.000000e+00 : f32
    %160 = vector.broadcast %cst_66 : f32 to vector<8x128xf32>
    %161 = arith.addf %160, %159 : vector<8x128xf32>
    %162 = arith.mulf %151, %161 : vector<8x128xf32>
    %c0_67 = arith.constant 0 : index
    %c0_68 = arith.constant 0 : index
    %c0_69 = arith.constant 0 : index
    %163 = vector.load %arg12[%c0_67, %c0_68, %c0_69] : memref<2x128x32xbf16, #tpu.memory_space<vmem>>, vector<1x128x32xbf16>
    %164 = vector.shape_cast %163 : vector<1x128x32xbf16> to vector<128x32xbf16>
    %165 = arith.truncf %162 : vector<8x128xf32> to vector<8x128xbf16>
    %cst_70 = arith.constant dense<0.000000e+00> : vector<8x32xf32>
    %166 = tpu.matmul %165, %164, %cst_70 {dimension_numbers = #tpu.dot_dimension_numbers<[1], [0], [0], [1], [0, 0, 1, 1], [], []>} : vector<8x128xbf16>, vector<128x32xbf16>, vector<8x32xf32> -> vector<8x32xf32>
    %167 = arith.addf %115, %166 : vector<8x32xf32>
    %c0_71 = arith.constant 0 : index
    %c0_72 = arith.constant 0 : index
    %c0_73 = arith.constant 0 : index
    %168 = vector.load %arg13[%c0_71, %c0_72, %c0_73] : memref<2x1x32xf32, #tpu.memory_space<vmem>>, vector<1x1x32xf32>
    %169 = vector.shape_cast %168 : vector<1x1x32xf32> to vector<1x32xf32>
    %170 = vector.broadcast %169 : vector<1x32xf32> to vector<8x32xf32>
    %171 = arith.addf %167, %170 : vector<8x32xf32>
    %c1 = arith.constant 1 : index
    %c0_74 = arith.constant 0 : index
    %c0_75 = arith.constant 0 : index
    %172 = vector.load %arg2[%c1, %c0_74, %c0_75] : memref<2x1x32xf32, #tpu.memory_space<vmem>>, vector<1x1x32xf32>
    %173 = vector.shape_cast %172 : vector<1x1x32xf32> to vector<1x32xf32>
    %c1_76 = arith.constant 1 : index
    %c0_77 = arith.constant 0 : index
    %c0_78 = arith.constant 0 : index
    %174 = vector.load %arg3[%c1_76, %c0_77, %c0_78] : memref<2x1x32xf32, #tpu.memory_space<vmem>>, vector<1x1x32xf32>
    %175 = vector.shape_cast %174 : vector<1x1x32xf32> to vector<1x32xf32>
    %cst_79 = arith.constant dense<0.000000e+00> : vector<8xf32>
    %176 = vector.multi_reduction <add>, %171, %cst_79 [1] : vector<8x32xf32> to vector<8xf32>
    %177 = vector.shape_cast %176 : vector<8xf32> to vector<8x1xf32>
    %cst_80 = arith.constant 3.200000e+01 : f32
    %178 = vector.broadcast %cst_80 : f32 to vector<8x1xf32>
    %179 = arith.divf %177, %178 : vector<8x1xf32>
    %180 = vector.broadcast %179 : vector<8x1xf32> to vector<8x32xf32>
    %181 = arith.subf %171, %180 : vector<8x32xf32>
    %182 = arith.mulf %181, %181 : vector<8x32xf32>
    %cst_81 = arith.constant dense<0.000000e+00> : vector<8xf32>
    %183 = vector.multi_reduction <add>, %182, %cst_81 [1] : vector<8x32xf32> to vector<8xf32>
    %184 = vector.shape_cast %183 : vector<8xf32> to vector<8x1xf32>
    %cst_82 = arith.constant 3.200000e+01 : f32
    %185 = vector.broadcast %cst_82 : f32 to vector<8x1xf32>
    %186 = arith.divf %184, %185 : vector<8x1xf32>
    %187 = vector.broadcast %179 : vector<8x1xf32> to vector<8x32xf32>
    %188 = arith.subf %171, %187 : vector<8x32xf32>
    %cst_83 = arith.constant 9.99999974E-6 : f32
    %189 = vector.broadcast %cst_83 : f32 to vector<8x1xf32>
    %190 = arith.addf %186, %189 : vector<8x1xf32>
    %191 = math.rsqrt %190 : vector<8x1xf32>
    %192 = vector.broadcast %191 : vector<8x1xf32> to vector<8x32xf32>
    %193 = arith.mulf %188, %192 : vector<8x32xf32>
    %194 = vector.broadcast %173 : vector<1x32xf32> to vector<8x32xf32>
    %195 = arith.mulf %193, %194 : vector<8x32xf32>
    %196 = vector.broadcast %175 : vector<1x32xf32> to vector<8x32xf32>
    %197 = arith.addf %195, %196 : vector<8x32xf32>
    %c1_84 = arith.constant 1 : index
    %c0_85 = arith.constant 0 : index
    %c0_86 = arith.constant 0 : index
    %198 = vector.load %arg4[%c1_84, %c0_85, %c0_86] : memref<2x32x96xbf16, #tpu.memory_space<vmem>>, vector<1x32x96xbf16>
    %199 = vector.shape_cast %198 : vector<1x32x96xbf16> to vector<32x96xbf16>
    %200 = arith.truncf %197 : vector<8x32xf32> to vector<8x32xbf16>
    %cst_87 = arith.constant dense<0.000000e+00> : vector<8x96xf32>
    %201 = tpu.matmul %200, %199, %cst_87 {dimension_numbers = #tpu.dot_dimension_numbers<[1], [0], [0], [1], [0, 0, 1, 1], [], []>} : vector<8x32xbf16>, vector<32x96xbf16>, vector<8x96xf32> -> vector<8x96xf32>
    %c1_88 = arith.constant 1 : index
    %c0_89 = arith.constant 0 : index
    %c0_90 = arith.constant 0 : index
    %202 = vector.load %arg5[%c1_88, %c0_89, %c0_90] : memref<2x1x96xf32, #tpu.memory_space<vmem>>, vector<1x1x96xf32>
    %203 = vector.shape_cast %202 : vector<1x1x96xf32> to vector<1x96xf32>
    %204 = vector.broadcast %203 : vector<1x96xf32> to vector<8x96xf32>
    %205 = arith.addf %201, %204 : vector<8x96xf32>
    %206 = vector.extract_strided_slice %205 {offsets = [0, 0], sizes = [8, 8], strides = [1, 1]} : vector<8x96xf32> to vector<8x8xf32>
    %207 = vector.extract_strided_slice %205 {offsets = [0, 32], sizes = [8, 8], strides = [1, 1]} : vector<8x96xf32> to vector<8x8xf32>
    %208 = vector.extract_strided_slice %205 {offsets = [0, 64], sizes = [8, 8], strides = [1, 1]} : vector<8x96xf32> to vector<8x8xf32>
    %cst_91 = arith.constant dense<0.000000e+00> : vector<8x8xf32>
    %209 = tpu.matmul %206, %207, %cst_91 {dimension_numbers = #tpu.dot_dimension_numbers<[1], [1], [0], [0], [0, 0, 1, 0], [], []>} : vector<8x8xf32>, vector<8x8xf32>, vector<8x8xf32> -> vector<8x8xf32>
    %cst_92 = arith.constant -1.000000e+30 : f32
    %210 = vector.broadcast %cst_92 : f32 to vector<8x8xf32>
    %211 = arith.select %2, %209, %210 : vector<8x8xi1>, vector<8x8xf32>
    %cst_93 = arith.constant dense<0xFF800000> : vector<8xf32>
    %212 = vector.multi_reduction <maximumf>, %211, %cst_93 [1] : vector<8x8xf32> to vector<8xf32>
    %213 = vector.shape_cast %212 : vector<8xf32> to vector<8x1xf32>
    %214 = vector.broadcast %213 : vector<8x1xf32> to vector<8x8xf32>
    %215 = arith.subf %211, %214 : vector<8x8xf32>
    %216 = math.exp %215 : vector<8x8xf32>
    %cst_94 = arith.constant dense<0.000000e+00> : vector<8xf32>
    %217 = vector.multi_reduction <add>, %216, %cst_94 [1] : vector<8x8xf32> to vector<8xf32>
    %218 = vector.shape_cast %217 : vector<8xf32> to vector<8x1xf32>
    %219 = tpu.reciprocal %218 {approx = true} : vector<8x1xf32> -> vector<8x1xf32>
    %220 = vector.broadcast %219 : vector<8x1xf32> to vector<8x8xf32>
    %221 = arith.mulf %216, %220 : vector<8x8xf32>
    %cst_95 = arith.constant dense<0.000000e+00> : vector<8x8xf32>
    %222 = tpu.matmul %221, %208, %cst_95 {dimension_numbers = #tpu.dot_dimension_numbers<[1], [0], [0], [1], [0, 0, 1, 1], [], []>} : vector<8x8xf32>, vector<8x8xf32>, vector<8x8xf32> -> vector<8x8xf32>
    %223 = vector.extract_strided_slice %205 {offsets = [0, 8], sizes = [8, 8], strides = [1, 1]} : vector<8x96xf32> to vector<8x8xf32>
    %224 = vector.extract_strided_slice %205 {offsets = [0, 40], sizes = [8, 8], strides = [1, 1]} : vector<8x96xf32> to vector<8x8xf32>
    %225 = vector.extract_strided_slice %205 {offsets = [0, 72], sizes = [8, 8], strides = [1, 1]} : vector<8x96xf32> to vector<8x8xf32>
    %cst_96 = arith.constant dense<0.000000e+00> : vector<8x8xf32>
    %226 = tpu.matmul %223, %224, %cst_96 {dimension_numbers = #tpu.dot_dimension_numbers<[1], [1], [0], [0], [0, 0, 1, 0], [], []>} : vector<8x8xf32>, vector<8x8xf32>, vector<8x8xf32> -> vector<8x8xf32>
    %cst_97 = arith.constant -1.000000e+30 : f32
    %227 = vector.broadcast %cst_97 : f32 to vector<8x8xf32>
    %228 = arith.select %2, %226, %227 : vector<8x8xi1>, vector<8x8xf32>
    %cst_98 = arith.constant dense<0xFF800000> : vector<8xf32>
    %229 = vector.multi_reduction <maximumf>, %228, %cst_98 [1] : vector<8x8xf32> to vector<8xf32>
    %230 = vector.shape_cast %229 : vector<8xf32> to vector<8x1xf32>
    %231 = vector.broadcast %230 : vector<8x1xf32> to vector<8x8xf32>
    %232 = arith.subf %228, %231 : vector<8x8xf32>
    %233 = math.exp %232 : vector<8x8xf32>
    %cst_99 = arith.constant dense<0.000000e+00> : vector<8xf32>
    %234 = vector.multi_reduction <add>, %233, %cst_99 [1] : vector<8x8xf32> to vector<8xf32>
    %235 = vector.shape_cast %234 : vector<8xf32> to vector<8x1xf32>
    %236 = tpu.reciprocal %235 {approx = true} : vector<8x1xf32> -> vector<8x1xf32>
    %237 = vector.broadcast %236 : vector<8x1xf32> to vector<8x8xf32>
    %238 = arith.mulf %233, %237 : vector<8x8xf32>
    %cst_100 = arith.constant dense<0.000000e+00> : vector<8x8xf32>
    %239 = tpu.matmul %238, %225, %cst_100 {dimension_numbers = #tpu.dot_dimension_numbers<[1], [0], [0], [1], [0, 0, 1, 1], [], []>} : vector<8x8xf32>, vector<8x8xf32>, vector<8x8xf32> -> vector<8x8xf32>
    %240 = vector.extract_strided_slice %205 {offsets = [0, 16], sizes = [8, 8], strides = [1, 1]} : vector<8x96xf32> to vector<8x8xf32>
    %241 = vector.extract_strided_slice %205 {offsets = [0, 48], sizes = [8, 8], strides = [1, 1]} : vector<8x96xf32> to vector<8x8xf32>
    %242 = vector.extract_strided_slice %205 {offsets = [0, 80], sizes = [8, 8], strides = [1, 1]} : vector<8x96xf32> to vector<8x8xf32>
    %cst_101 = arith.constant dense<0.000000e+00> : vector<8x8xf32>
    %243 = tpu.matmul %240, %241, %cst_101 {dimension_numbers = #tpu.dot_dimension_numbers<[1], [1], [0], [0], [0, 0, 1, 0], [], []>} : vector<8x8xf32>, vector<8x8xf32>, vector<8x8xf32> -> vector<8x8xf32>
    %cst_102 = arith.constant -1.000000e+30 : f32
    %244 = vector.broadcast %cst_102 : f32 to vector<8x8xf32>
    %245 = arith.select %2, %243, %244 : vector<8x8xi1>, vector<8x8xf32>
    %cst_103 = arith.constant dense<0xFF800000> : vector<8xf32>
    %246 = vector.multi_reduction <maximumf>, %245, %cst_103 [1] : vector<8x8xf32> to vector<8xf32>
    %247 = vector.shape_cast %246 : vector<8xf32> to vector<8x1xf32>
    %248 = vector.broadcast %247 : vector<8x1xf32> to vector<8x8xf32>
    %249 = arith.subf %245, %248 : vector<8x8xf32>
    %250 = math.exp %249 : vector<8x8xf32>
    %cst_104 = arith.constant dense<0.000000e+00> : vector<8xf32>
    %251 = vector.multi_reduction <add>, %250, %cst_104 [1] : vector<8x8xf32> to vector<8xf32>
    %252 = vector.shape_cast %251 : vector<8xf32> to vector<8x1xf32>
    %253 = tpu.reciprocal %252 {approx = true} : vector<8x1xf32> -> vector<8x1xf32>
    %254 = vector.broadcast %253 : vector<8x1xf32> to vector<8x8xf32>
    %255 = arith.mulf %250, %254 : vector<8x8xf32>
    %cst_105 = arith.constant dense<0.000000e+00> : vector<8x8xf32>
    %256 = tpu.matmul %255, %242, %cst_105 {dimension_numbers = #tpu.dot_dimension_numbers<[1], [0], [0], [1], [0, 0, 1, 1], [], []>} : vector<8x8xf32>, vector<8x8xf32>, vector<8x8xf32> -> vector<8x8xf32>
    %257 = vector.extract_strided_slice %205 {offsets = [0, 24], sizes = [8, 8], strides = [1, 1]} : vector<8x96xf32> to vector<8x8xf32>
    %258 = vector.extract_strided_slice %205 {offsets = [0, 56], sizes = [8, 8], strides = [1, 1]} : vector<8x96xf32> to vector<8x8xf32>
    %259 = vector.extract_strided_slice %205 {offsets = [0, 88], sizes = [8, 8], strides = [1, 1]} : vector<8x96xf32> to vector<8x8xf32>
    %cst_106 = arith.constant dense<0.000000e+00> : vector<8x8xf32>
    %260 = tpu.matmul %257, %258, %cst_106 {dimension_numbers = #tpu.dot_dimension_numbers<[1], [1], [0], [0], [0, 0, 1, 0], [], []>} : vector<8x8xf32>, vector<8x8xf32>, vector<8x8xf32> -> vector<8x8xf32>
    %cst_107 = arith.constant -1.000000e+30 : f32
    %261 = vector.broadcast %cst_107 : f32 to vector<8x8xf32>
    %262 = arith.select %2, %260, %261 : vector<8x8xi1>, vector<8x8xf32>
    %cst_108 = arith.constant dense<0xFF800000> : vector<8xf32>
    %263 = vector.multi_reduction <maximumf>, %262, %cst_108 [1] : vector<8x8xf32> to vector<8xf32>
    %264 = vector.shape_cast %263 : vector<8xf32> to vector<8x1xf32>
    %265 = vector.broadcast %264 : vector<8x1xf32> to vector<8x8xf32>
    %266 = arith.subf %262, %265 : vector<8x8xf32>
    %267 = math.exp %266 : vector<8x8xf32>
    %cst_109 = arith.constant dense<0.000000e+00> : vector<8xf32>
    %268 = vector.multi_reduction <add>, %267, %cst_109 [1] : vector<8x8xf32> to vector<8xf32>
    %269 = vector.shape_cast %268 : vector<8xf32> to vector<8x1xf32>
    %270 = tpu.reciprocal %269 {approx = true} : vector<8x1xf32> -> vector<8x1xf32>
    %271 = vector.broadcast %270 : vector<8x1xf32> to vector<8x8xf32>
    %272 = arith.mulf %267, %271 : vector<8x8xf32>
    %cst_110 = arith.constant dense<0.000000e+00> : vector<8x8xf32>
    %273 = tpu.matmul %272, %259, %cst_110 {dimension_numbers = #tpu.dot_dimension_numbers<[1], [0], [0], [1], [0, 0, 1, 1], [], []>} : vector<8x8xf32>, vector<8x8xf32>, vector<8x8xf32> -> vector<8x8xf32>
    %274 = tpu.concatenate %222, %239, %256, %273 in 1 : vector<8x8xf32>, vector<8x8xf32>, vector<8x8xf32>, vector<8x8xf32> -> vector<8x32xf32>
    %c1_111 = arith.constant 1 : index
    %c0_112 = arith.constant 0 : index
    %c0_113 = arith.constant 0 : index
    %275 = vector.load %arg6[%c1_111, %c0_112, %c0_113] : memref<2x32x32xbf16, #tpu.memory_space<vmem>>, vector<1x32x32xbf16>
    %276 = vector.shape_cast %275 : vector<1x32x32xbf16> to vector<32x32xbf16>
    %277 = arith.truncf %274 : vector<8x32xf32> to vector<8x32xbf16>
    %cst_114 = arith.constant dense<0.000000e+00> : vector<8x32xf32>
    %278 = tpu.matmul %277, %276, %cst_114 {dimension_numbers = #tpu.dot_dimension_numbers<[1], [0], [0], [1], [0, 0, 1, 1], [], []>} : vector<8x32xbf16>, vector<32x32xbf16>, vector<8x32xf32> -> vector<8x32xf32>
    %279 = arith.addf %171, %278 : vector<8x32xf32>
    %c1_115 = arith.constant 1 : index
    %c0_116 = arith.constant 0 : index
    %c0_117 = arith.constant 0 : index
    %280 = vector.load %arg7[%c1_115, %c0_116, %c0_117] : memref<2x1x32xf32, #tpu.memory_space<vmem>>, vector<1x1x32xf32>
    %281 = vector.shape_cast %280 : vector<1x1x32xf32> to vector<1x32xf32>
    %282 = vector.broadcast %281 : vector<1x32xf32> to vector<8x32xf32>
    %283 = arith.addf %279, %282 : vector<8x32xf32>
    %c1_118 = arith.constant 1 : index
    %c0_119 = arith.constant 0 : index
    %c0_120 = arith.constant 0 : index
    %284 = vector.load %arg8[%c1_118, %c0_119, %c0_120] : memref<2x1x32xf32, #tpu.memory_space<vmem>>, vector<1x1x32xf32>
    %285 = vector.shape_cast %284 : vector<1x1x32xf32> to vector<1x32xf32>
    %c1_121 = arith.constant 1 : index
    %c0_122 = arith.constant 0 : index
    %c0_123 = arith.constant 0 : index
    %286 = vector.load %arg9[%c1_121, %c0_122, %c0_123] : memref<2x1x32xf32, #tpu.memory_space<vmem>>, vector<1x1x32xf32>
    %287 = vector.shape_cast %286 : vector<1x1x32xf32> to vector<1x32xf32>
    %cst_124 = arith.constant dense<0.000000e+00> : vector<8xf32>
    %288 = vector.multi_reduction <add>, %283, %cst_124 [1] : vector<8x32xf32> to vector<8xf32>
    %289 = vector.shape_cast %288 : vector<8xf32> to vector<8x1xf32>
    %cst_125 = arith.constant 3.200000e+01 : f32
    %290 = vector.broadcast %cst_125 : f32 to vector<8x1xf32>
    %291 = arith.divf %289, %290 : vector<8x1xf32>
    %292 = vector.broadcast %291 : vector<8x1xf32> to vector<8x32xf32>
    %293 = arith.subf %283, %292 : vector<8x32xf32>
    %294 = arith.mulf %293, %293 : vector<8x32xf32>
    %cst_126 = arith.constant dense<0.000000e+00> : vector<8xf32>
    %295 = vector.multi_reduction <add>, %294, %cst_126 [1] : vector<8x32xf32> to vector<8xf32>
    %296 = vector.shape_cast %295 : vector<8xf32> to vector<8x1xf32>
    %cst_127 = arith.constant 3.200000e+01 : f32
    %297 = vector.broadcast %cst_127 : f32 to vector<8x1xf32>
    %298 = arith.divf %296, %297 : vector<8x1xf32>
    %299 = vector.broadcast %291 : vector<8x1xf32> to vector<8x32xf32>
    %300 = arith.subf %283, %299 : vector<8x32xf32>
    %cst_128 = arith.constant 9.99999974E-6 : f32
    %301 = vector.broadcast %cst_128 : f32 to vector<8x1xf32>
    %302 = arith.addf %298, %301 : vector<8x1xf32>
    %303 = math.rsqrt %302 : vector<8x1xf32>
    %304 = vector.broadcast %303 : vector<8x1xf32> to vector<8x32xf32>
    %305 = arith.mulf %300, %304 : vector<8x32xf32>
    %306 = vector.broadcast %285 : vector<1x32xf32> to vector<8x32xf32>
    %307 = arith.mulf %305, %306 : vector<8x32xf32>
    %308 = vector.broadcast %287 : vector<1x32xf32> to vector<8x32xf32>
    %309 = arith.addf %307, %308 : vector<8x32xf32>
    %c1_129 = arith.constant 1 : index
    %c0_130 = arith.constant 0 : index
    %c0_131 = arith.constant 0 : index
    %310 = vector.load %arg10[%c1_129, %c0_130, %c0_131] : memref<2x32x128xbf16, #tpu.memory_space<vmem>>, vector<1x32x128xbf16>
    %311 = vector.shape_cast %310 : vector<1x32x128xbf16> to vector<32x128xbf16>
    %312 = arith.truncf %309 : vector<8x32xf32> to vector<8x32xbf16>
    %cst_132 = arith.constant dense<0.000000e+00> : vector<8x128xf32>
    %313 = tpu.matmul %312, %311, %cst_132 {dimension_numbers = #tpu.dot_dimension_numbers<[1], [0], [0], [1], [0, 0, 1, 1], [], []>} : vector<8x32xbf16>, vector<32x128xbf16>, vector<8x128xf32> -> vector<8x128xf32>
    %c1_133 = arith.constant 1 : index
    %c0_134 = arith.constant 0 : index
    %c0_135 = arith.constant 0 : index
    %314 = vector.load %arg11[%c1_133, %c0_134, %c0_135] : memref<2x1x128xf32, #tpu.memory_space<vmem>>, vector<1x1x128xf32>
    %315 = vector.shape_cast %314 : vector<1x1x128xf32> to vector<1x128xf32>
    %316 = vector.broadcast %315 : vector<1x128xf32> to vector<8x128xf32>
    %317 = arith.addf %313, %316 : vector<8x128xf32>
    %cst_136 = arith.constant 5.000000e-01 : f32
    %318 = vector.broadcast %cst_136 : f32 to vector<8x128xf32>
    %319 = arith.mulf %318, %317 : vector<8x128xf32>
    %cst_137 = arith.constant 4.471500e-02 : f32
    %320 = vector.broadcast %cst_137 : f32 to vector<8x128xf32>
    %321 = arith.mulf %320, %317 : vector<8x128xf32>
    %322 = arith.mulf %321, %317 : vector<8x128xf32>
    %323 = arith.mulf %322, %317 : vector<8x128xf32>
    %324 = arith.addf %317, %323 : vector<8x128xf32>
    %cst_138 = arith.constant 0.797884583 : f32
    %325 = vector.broadcast %cst_138 : f32 to vector<8x128xf32>
    %326 = arith.mulf %325, %324 : vector<8x128xf32>
    %327 = math.tanh %326 : vector<8x128xf32>
    %cst_139 = arith.constant 1.000000e+00 : f32
    %328 = vector.broadcast %cst_139 : f32 to vector<8x128xf32>
    %329 = arith.addf %328, %327 : vector<8x128xf32>
    %330 = arith.mulf %319, %329 : vector<8x128xf32>
    %c1_140 = arith.constant 1 : index
    %c0_141 = arith.constant 0 : index
    %c0_142 = arith.constant 0 : index
    %331 = vector.load %arg12[%c1_140, %c0_141, %c0_142] : memref<2x128x32xbf16, #tpu.memory_space<vmem>>, vector<1x128x32xbf16>
    %332 = vector.shape_cast %331 : vector<1x128x32xbf16> to vector<128x32xbf16>
    %333 = arith.truncf %330 : vector<8x128xf32> to vector<8x128xbf16>
    %cst_143 = arith.constant dense<0.000000e+00> : vector<8x32xf32>
    %334 = tpu.matmul %333, %332, %cst_143 {dimension_numbers = #tpu.dot_dimension_numbers<[1], [0], [0], [1], [0, 0, 1, 1], [], []>} : vector<8x128xbf16>, vector<128x32xbf16>, vector<8x32xf32> -> vector<8x32xf32>
    %335 = arith.addf %283, %334 : vector<8x32xf32>
    %c1_144 = arith.constant 1 : index
    %c0_145 = arith.constant 0 : index
    %c0_146 = arith.constant 0 : index
    %336 = vector.load %arg13[%c1_144, %c0_145, %c0_146] : memref<2x1x32xf32, #tpu.memory_space<vmem>>, vector<1x1x32xf32>
    %337 = vector.shape_cast %336 : vector<1x1x32xf32> to vector<1x32xf32>
    %338 = vector.broadcast %337 : vector<1x32xf32> to vector<8x32xf32>
    %339 = arith.addf %335, %338 : vector<8x32xf32>
    %c0_147 = arith.constant 0 : index
    %c0_148 = arith.constant 0 : index
    %340 = vector.load %arg14[%c0_147, %c0_148] : memref<1x32xf32, #tpu.memory_space<vmem>>, vector<1x32xf32>
    %c0_149 = arith.constant 0 : index
    %c0_150 = arith.constant 0 : index
    %341 = vector.load %arg15[%c0_149, %c0_150] : memref<1x32xf32, #tpu.memory_space<vmem>>, vector<1x32xf32>
    %cst_151 = arith.constant dense<0.000000e+00> : vector<8xf32>
    %342 = vector.multi_reduction <add>, %339, %cst_151 [1] : vector<8x32xf32> to vector<8xf32>
    %343 = vector.shape_cast %342 : vector<8xf32> to vector<8x1xf32>
    %cst_152 = arith.constant 3.200000e+01 : f32
    %344 = vector.broadcast %cst_152 : f32 to vector<8x1xf32>
    %345 = arith.divf %343, %344 : vector<8x1xf32>
    %346 = vector.broadcast %345 : vector<8x1xf32> to vector<8x32xf32>
    %347 = arith.subf %339, %346 : vector<8x32xf32>
    %348 = arith.mulf %347, %347 : vector<8x32xf32>
    %cst_153 = arith.constant dense<0.000000e+00> : vector<8xf32>
    %349 = vector.multi_reduction <add>, %348, %cst_153 [1] : vector<8x32xf32> to vector<8xf32>
    %350 = vector.shape_cast %349 : vector<8xf32> to vector<8x1xf32>
    %cst_154 = arith.constant 3.200000e+01 : f32
    %351 = vector.broadcast %cst_154 : f32 to vector<8x1xf32>
    %352 = arith.divf %350, %351 : vector<8x1xf32>
    %353 = vector.broadcast %345 : vector<8x1xf32> to vector<8x32xf32>
    %354 = arith.subf %339, %353 : vector<8x32xf32>
    %cst_155 = arith.constant 9.99999974E-6 : f32
    %355 = vector.broadcast %cst_155 : f32 to vector<8x1xf32>
    %356 = arith.addf %352, %355 : vector<8x1xf32>
    %357 = math.rsqrt %356 : vector<8x1xf32>
    %358 = vector.broadcast %357 : vector<8x1xf32> to vector<8x32xf32>
    %359 = arith.mulf %354, %358 : vector<8x32xf32>
    %360 = vector.broadcast %340 : vector<1x32xf32> to vector<8x32xf32>
    %361 = arith.mulf %359, %360 : vector<8x32xf32>
    %362 = vector.broadcast %341 : vector<1x32xf32> to vector<8x32xf32>
    %363 = arith.addf %361, %362 : vector<8x32xf32>
    %c0_156 = arith.constant 0 : index
    %c0_157 = arith.constant 0 : index
    %364 = vector.load %arg17[%c0_156, %c0_157] : memref<8x16xf32, #tpu.memory_space<vmem>>, vector<8x16xf32>
    %c0_158 = arith.constant 0 : index
    %c0_159 = arith.constant 0 : index
    %365 = vector.load %arg18[%c0_158, %c0_159] : memref<16x32xbf16, #tpu.memory_space<vmem>>, vector<16x32xbf16>
    %366 = arith.truncf %364 : vector<8x16xf32> to vector<8x16xbf16>
    %cst_160 = arith.constant dense<0.000000e+00> : vector<8x32xf32>
    %367 = tpu.matmul %366, %365, %cst_160 {dimension_numbers = #tpu.dot_dimension_numbers<[1], [0], [0], [1], [0, 0, 1, 1], [], []>} : vector<8x16xbf16>, vector<16x32xbf16>, vector<8x32xf32> -> vector<8x32xf32>
    %c0_161 = arith.constant 0 : index
    %c0_162 = arith.constant 0 : index
    %368 = vector.load %arg19[%c0_161, %c0_162] : memref<1x32xf32, #tpu.memory_space<vmem>>, vector<1x32xf32>
    %369 = vector.broadcast %368 : vector<1x32xf32> to vector<8x32xf32>
    %370 = arith.addf %367, %369 : vector<8x32xf32>
    %c0_163 = arith.constant 0 : index
    %c0_164 = arith.constant 0 : index
    %371 = vector.load %arg20[%c0_163, %c0_164] : memref<32x32xbf16, #tpu.memory_space<vmem>>, vector<32x32xbf16>
    %372 = arith.truncf %370 : vector<8x32xf32> to vector<8x32xbf16>
    %cst_165 = arith.constant dense<0.000000e+00> : vector<8x32xf32>
    %373 = tpu.matmul %372, %371, %cst_165 {dimension_numbers = #tpu.dot_dimension_numbers<[1], [0], [0], [1], [0, 0, 1, 1], [], []>} : vector<8x32xbf16>, vector<32x32xbf16>, vector<8x32xf32> -> vector<8x32xf32>
    %c0_166 = arith.constant 0 : index
    %c0_167 = arith.constant 0 : index
    %374 = vector.load %arg21[%c0_166, %c0_167] : memref<1x32xf32, #tpu.memory_space<vmem>>, vector<1x32xf32>
    %375 = vector.broadcast %374 : vector<1x32xf32> to vector<8x32xf32>
    %376 = arith.addf %373, %375 : vector<8x32xf32>
    %c0_168 = arith.constant 0 : index
    %c0_169 = arith.constant 0 : index
    %377 = vector.load %arg22[%c0_168, %c0_169] : memref<32x32xbf16, #tpu.memory_space<vmem>>, vector<32x32xbf16>
    %378 = arith.truncf %376 : vector<8x32xf32> to vector<8x32xbf16>
    %cst_170 = arith.constant dense<0.000000e+00> : vector<8x32xf32>
    %379 = tpu.matmul %378, %377, %cst_170 {dimension_numbers = #tpu.dot_dimension_numbers<[1], [0], [0], [1], [0, 0, 1, 1], [], []>} : vector<8x32xbf16>, vector<32x32xbf16>, vector<8x32xf32> -> vector<8x32xf32>
    %c0_171 = arith.constant 0 : index
    %c0_172 = arith.constant 0 : index
    %380 = vector.load %arg23[%c0_171, %c0_172] : memref<1x32xf32, #tpu.memory_space<vmem>>, vector<1x32xf32>
    %381 = vector.broadcast %380 : vector<1x32xf32> to vector<8x32xf32>
    %382 = arith.addf %379, %381 : vector<8x32xf32>
    %383 = arith.addf %363, %382 : vector<8x32xf32>
    %c0_173 = arith.constant 0 : index
    %c0_174 = arith.constant 0 : index
    %384 = vector.load %arg24[%c0_173, %c0_174] : memref<1x32xf32, #tpu.memory_space<vmem>>, vector<1x32xf32>
    %c0_175 = arith.constant 0 : index
    %c0_176 = arith.constant 0 : index
    %385 = vector.load %arg25[%c0_175, %c0_176] : memref<1x32xf32, #tpu.memory_space<vmem>>, vector<1x32xf32>
    %cst_177 = arith.constant dense<0.000000e+00> : vector<8xf32>
    %386 = vector.multi_reduction <add>, %383, %cst_177 [1] : vector<8x32xf32> to vector<8xf32>
    %387 = vector.shape_cast %386 : vector<8xf32> to vector<8x1xf32>
    %cst_178 = arith.constant 3.200000e+01 : f32
    %388 = vector.broadcast %cst_178 : f32 to vector<8x1xf32>
    %389 = arith.divf %387, %388 : vector<8x1xf32>
    %390 = vector.broadcast %389 : vector<8x1xf32> to vector<8x32xf32>
    %391 = arith.subf %383, %390 : vector<8x32xf32>
    %392 = arith.mulf %391, %391 : vector<8x32xf32>
    %cst_179 = arith.constant dense<0.000000e+00> : vector<8xf32>
    %393 = vector.multi_reduction <add>, %392, %cst_179 [1] : vector<8x32xf32> to vector<8xf32>
    %394 = vector.shape_cast %393 : vector<8xf32> to vector<8x1xf32>
    %cst_180 = arith.constant 3.200000e+01 : f32
    %395 = vector.broadcast %cst_180 : f32 to vector<8x1xf32>
    %396 = arith.divf %394, %395 : vector<8x1xf32>
    %397 = vector.broadcast %389 : vector<8x1xf32> to vector<8x32xf32>
    %398 = arith.subf %383, %397 : vector<8x32xf32>
    %cst_181 = arith.constant 9.99999974E-6 : f32
    %399 = vector.broadcast %cst_181 : f32 to vector<8x1xf32>
    %400 = arith.addf %396, %399 : vector<8x1xf32>
    %401 = math.rsqrt %400 : vector<8x1xf32>
    %402 = vector.broadcast %401 : vector<8x1xf32> to vector<8x32xf32>
    %403 = arith.mulf %398, %402 : vector<8x32xf32>
    %404 = vector.broadcast %384 : vector<1x32xf32> to vector<8x32xf32>
    %405 = arith.mulf %403, %404 : vector<8x32xf32>
    %406 = vector.broadcast %385 : vector<1x32xf32> to vector<8x32xf32>
    %407 = arith.addf %405, %406 : vector<8x32xf32>
    %408 = arith.truncf %407 : vector<8x32xf32> to vector<8x32xbf16>
    %c0_182 = arith.constant 0 : index
    %c0_183 = arith.constant 0 : index
    %409 = vector.load %arg16[%c0_182, %c0_183] : memref<128x32xbf16, #tpu.memory_space<vmem>>, vector<128x32xbf16>
    %cst_184 = arith.constant dense<0.000000e+00> : vector<8x128xf32>
    %410 = tpu.matmul %408, %409, %cst_184 {dimension_numbers = #tpu.dot_dimension_numbers<[1], [1], [0], [0], [0, 0, 1, 0], [], []>} : vector<8x32xbf16>, vector<128x32xbf16>, vector<8x128xf32> -> vector<8x128xf32>
    %c0_185 = arith.constant 0 : index
    %c0_186 = arith.constant 0 : index
    %411 = vector.load %arg26[%c0_185, %c0_186] : memref<8x128xf32, #tpu.memory_space<vmem>>, vector<8x128xf32>
    tpu.vector_store %arg26[%c0_185, %c0_186], %410 {strides = array<i32>} : memref<8x128xf32, #tpu.memory_space<vmem>>, vector<8x128xf32>,
    return
  }
  func.func @transform_0(%arg0: i32) -> (i32, i32) {
    %c0_i32 = arith.constant 0 : i32
    %c0_i32_0 = arith.constant 0 : i32
    return %arg0, %c0_i32 : i32, i32
  }
  func.func @transform_1(%arg0: i32) -> (i32, i32, i32) {
    %c0_i32 = arith.constant 0 : i32
    %c0_i32_0 = arith.constant 0 : i32
    %c0_i32_1 = arith.constant 0 : i32
    %c0_i32_2 = arith.constant 0 : i32
    return %c0_i32, %c0_i32_0, %c0_i32_1 : i32, i32, i32
  }
  func.func @transform_2(%arg0: i32) -> (i32, i32, i32) {
    %c0_i32 = arith.constant 0 : i32
    %c0_i32_0 = arith.constant 0 : i32
    %c0_i32_1 = arith.constant 0 : i32
    %c0_i32_2 = arith.constant 0 : i32
    return %c0_i32, %c0_i32_0, %c0_i32_1 : i32, i32, i32
  }
  func.func @transform_3(%arg0: i32) -> (i32, i32, i32) {
    %c0_i32 = arith.constant 0 : i32
    %c0_i32_0 = arith.constant 0 : i32
    %c0_i32_1 = arith.constant 0 : i32
    %c0_i32_2 = arith.constant 0 : i32
    return %c0_i32, %c0_i32_0, %c0_i32_1 : i32, i32, i32
  }
  func.func @transform_4(%arg0: i32) -> (i32, i32, i32) {
    %c0_i32 = arith.constant 0 : i32
    %c0_i32_0 = arith.constant 0 : i32
    %c0_i32_1 = arith.constant 0 : i32
    %c0_i32_2 = arith.constant 0 : i32
    return %c0_i32, %c0_i32_0, %c0_i32_1 : i32, i32, i32
  }
  func.func @transform_5(%arg0: i32) -> (i32, i32, i32) {
    %c0_i32 = arith.constant 0 : i32
    %c0_i32_0 = arith.constant 0 : i32
    %c0_i32_1 = arith.constant 0 : i32
    %c0_i32_2 = arith.constant 0 : i32
    return %c0_i32, %c0_i32_0, %c0_i32_1 : i32, i32, i32
  }
  func.func @transform_6(%arg0: i32) -> (i32, i32, i32) {
    %c0_i32 = arith.constant 0 : i32
    %c0_i32_0 = arith.constant 0 : i32
    %c0_i32_1 = arith.constant 0 : i32
    %c0_i32_2 = arith.constant 0 : i32
    return %c0_i32, %c0_i32_0, %c0_i32_1 : i32, i32, i32
  }
  func.func @transform_7(%arg0: i32) -> (i32, i32, i32) {
    %c0_i32 = arith.constant 0 : i32
    %c0_i32_0 = arith.constant 0 : i32
    %c0_i32_1 = arith.constant 0 : i32
    %c0_i32_2 = arith.constant 0 : i32
    return %c0_i32, %c0_i32_0, %c0_i32_1 : i32, i32, i32
  }
  func.func @transform_8(%arg0: i32) -> (i32, i32, i32) {
    %c0_i32 = arith.constant 0 : i32
    %c0_i32_0 = arith.constant 0 : i32
    %c0_i32_1 = arith.constant 0 : i32
    %c0_i32_2 = arith.constant 0 : i32
    return %c0_i32, %c0_i32_0, %c0_i32_1 : i32, i32, i32
  }
  func.func @transform_9(%arg0: i32) -> (i32, i32, i32) {
    %c0_i32 = arith.constant 0 : i32
    %c0_i32_0 = arith.constant 0 : i32
    %c0_i32_1 = arith.constant 0 : i32
    %c0_i32_2 = arith.constant 0 : i32
    return %c0_i32, %c0_i32_0, %c0_i32_1 : i32, i32, i32
  }
  func.func @transform_10(%arg0: i32) -> (i32, i32, i32) {
    %c0_i32 = arith.constant 0 : i32
    %c0_i32_0 = arith.constant 0 : i32
    %c0_i32_1 = arith.constant 0 : i32
    %c0_i32_2 = arith.constant 0 : i32
    return %c0_i32, %c0_i32_0, %c0_i32_1 : i32, i32, i32
  }
  func.func @transform_11(%arg0: i32) -> (i32, i32, i32) {
    %c0_i32 = arith.constant 0 : i32
    %c0_i32_0 = arith.constant 0 : i32
    %c0_i32_1 = arith.constant 0 : i32
    %c0_i32_2 = arith.constant 0 : i32
    return %c0_i32, %c0_i32_0, %c0_i32_1 : i32, i32, i32
  }
  func.func @transform_12(%arg0: i32) -> (i32, i32, i32) {
    %c0_i32 = arith.constant 0 : i32
    %c0_i32_0 = arith.constant 0 : i32
    %c0_i32_1 = arith.constant 0 : i32
    %c0_i32_2 = arith.constant 0 : i32
    return %c0_i32, %c0_i32_0, %c0_i32_1 : i32, i32, i32
  }
  func.func @transform_13(%arg0: i32) -> (i32, i32) {
    %c0_i32 = arith.constant 0 : i32
    %c0_i32_0 = arith.constant 0 : i32
    %c0_i32_1 = arith.constant 0 : i32
    return %c0_i32, %c0_i32_0 : i32, i32
  }
  func.func @transform_14(%arg0: i32) -> (i32, i32) {
    %c0_i32 = arith.constant 0 : i32
    %c0_i32_0 = arith.constant 0 : i32
    %c0_i32_1 = arith.constant 0 : i32
    return %c0_i32, %c0_i32_0 : i32, i32
  }
  func.func @transform_15(%arg0: i32) -> (i32, i32) {
    %c0_i32 = arith.constant 0 : i32
    %c0_i32_0 = arith.constant 0 : i32
    %c0_i32_1 = arith.constant 0 : i32
    return %c0_i32, %c0_i32_0 : i32, i32
  }
  func.func @transform_16(%arg0: i32) -> (i32, i32) {
    %c0_i32 = arith.constant 0 : i32
    %c0_i32_0 = arith.constant 0 : i32
    return %arg0, %c0_i32 : i32, i32
  }
  func.func @transform_17(%arg0: i32) -> (i32, i32) {
    %c0_i32 = arith.constant 0 : i32
    %c0_i32_0 = arith.constant 0 : i32
    %c0_i32_1 = arith.constant 0 : i32
    return %c0_i32, %c0_i32_0 : i32, i32
  }
  func.func @transform_18(%arg0: i32) -> (i32, i32) {
    %c0_i32 = arith.constant 0 : i32
    %c0_i32_0 = arith.constant 0 : i32
    %c0_i32_1 = arith.constant 0 : i32
    return %c0_i32, %c0_i32_0 : i32, i32
  }
  func.func @transform_19(%arg0: i32) -> (i32, i32) {
    %c0_i32 = arith.constant 0 : i32
    %c0_i32_0 = arith.constant 0 : i32
    %c0_i32_1 = arith.constant 0 : i32
    return %c0_i32, %c0_i32_0 : i32, i32
  }
  func.func @transform_20(%arg0: i32) -> (i32, i32) {
    %c0_i32 = arith.constant 0 : i32
    %c0_i32_0 = arith.constant 0 : i32
    %c0_i32_1 = arith.constant 0 : i32
    return %c0_i32, %c0_i32_0 : i32, i32
  }
  func.func @transform_21(%arg0: i32) -> (i32, i32) {
    %c0_i32 = arith.constant 0 : i32
    %c0_i32_0 = arith.constant 0 : i32
    %c0_i32_1 = arith.constant 0 : i32
    return %c0_i32, %c0_i32_0 : i32, i32
  }
  func.func @transform_22(%arg0: i32) -> (i32, i32) {
    %c0_i32 = arith.constant 0 : i32
    %c0_i32_0 = arith.constant 0 : i32
    %c0_i32_1 = arith.constant 0 : i32
    return %c0_i32, %c0_i32_0 : i32, i32
  }
  func.func @transform_23(%arg0: i32) -> (i32, i32) {
    %c0_i32 = arith.constant 0 : i32
    %c0_i32_0 = arith.constant 0 : i32
    %c0_i32_1 = arith.constant 0 : i32
    return %c0_i32, %c0_i32_0 : i32, i32
  }
  func.func @transform_24(%arg0: i32) -> (i32, i32) {
    %c0_i32 = arith.constant 0 : i32
    %c0_i32_0 = arith.constant 0 : i32
    %c0_i32_1 = arith.constant 0 : i32
    return %c0_i32, %c0_i32_0 : i32, i32
  }
  func.func @transform_25(%arg0: i32) -> (i32, i32) {
    %c0_i32 = arith.constant 0 : i32
    %c0_i32_0 = arith.constant 0 : i32
    return %arg0, %c0_i32 : i32, i32
  }
}

</mosaic_0001>

<bundles_post_ra>
// kernel: multimodal_gpt2_forward.1
= control target key start
LH: loop header
LB: loop body
LE: loop exit
PB: predicated region body
PF: predicated region fallthrough
CT: control target
= control target key end

     0   :  { %s2769_s29 = smov 0   ;;  %s3172_s0 = inlined_call_operand.vmem [shape: f32[16,32], index: 0, kind: input, shape index: {}]   ;;  %s3173_s1 = inlined_call_operand.vmem [shape: f32[2,1,32], index: 1, kind: input, shape index: {}]   ;;  %s3174_s2 = inlined_call_operand.vmem [shape: f32[2,1,32], index: 2, kind: input, shape index: {}]   ;;  %s3175_s3 = inlined_call_operand.vmem [shape: bf16[2,32,96], index: 3, kind: input, shape index: {}]   ;;  %s3176_s4 = inlined_call_operand.vmem [shape: f32[2,1,96], index: 4, kind: input, shape index: {}]   ;;  %s3177_s5 = inlined_call_operand.vmem [shape: bf16[2,32,32], index: 5, kind: input, shape index: {}]   ;;  %s3178_s6 = inlined_call_operand.vmem [shape: f32[2,1,32], index: 6, kind: input, shape index: {}]   ;;  %s3179_s7 = inlined_call_operand.vmem [shape: f32[2,1,32], index: 7, kind: input, shape index: {}]   ;;  %s3180_s8 = inlined_call_operand.vmem [shape: f32[2,1,32], index: 8, kind: input, shape index: {}]   ;;  %s3181_s9 = inlined_call_operand.vmem [shape: bf16[2,32,128], index: 9, kind: input, shape index: {}]   ;;  %s3182_s10 = inlined_call_operand.vmem [shape: f32[2,1,128], index: 10, kind: input, shape index: {}]   ;;  %s3183_s11 = inlined_call_operand.vmem [shape: bf16[2,128,32], index: 11, kind: input, shape index: {}]   ;;  %s3184_s12 = inlined_call_operand.vmem [shape: f32[2,1,32], index: 12, kind: input, shape index: {}]   ;;  %s3185_s13 = inlined_call_operand.vmem [shape: f32[1,32], index: 13, kind: input, shape index: {}]   ;;  %s3186_s14 = inlined_call_operand.vmem [shape: f32[1,32], index: 14, kind: input, shape index: {}]   ;;  %s3187_s15 = inlined_call_operand.vmem [shape: bf16[128,32], index: 15, kind: input, shape index: {}]   ;;  %s3188_s16 = inlined_call_operand.vmem [shape: f32[16,16], index: 16, kind: input, shape index: {}]   ;;  %s3189_s17 = inlined_call_operand.vmem [shape: bf16[16,32], index: 17, kind: input, shape index: {}]   ;;  %s3190_s18 = inlined_call_operand.vmem [shape: f32[1,32], index: 18, kind: input, shape index: {}]   ;;  %s3191_s19 = inlined_call_operand.vmem [shape: bf16[32,32], index: 19, kind: input, shape index: {}]   ;;  %s3192_s20 = inlined_call_operand.vmem [shape: f32[1,32], index: 20, kind: input, shape index: {}]   ;;  %s3193_s21 = inlined_call_operand.vmem [shape: bf16[32,32], index: 21, kind: input, shape index: {}]   ;;  %s3194_s22 = inlined_call_operand.vmem [shape: f32[1,32], index: 22, kind: input, shape index: {}]   ;;  %s3195_s23 = inlined_call_operand.vmem [shape: f32[1,32], index: 23, kind: input, shape index: {}]   ;;  %s3196_s24 = inlined_call_operand.vmem [shape: f32[1,32], index: 24, kind: input, shape index: {}]   ;;  %s3197_s25 = inlined_call_operand.vmem [shape: f32[16,128], index: 25, kind: output, shape index: {}]  }
   0x1   :  { %3224 = sst [smem:[#allocation3_spill]] %s3172_s0 }
   0x2   :  { %3225 = sst [smem:[#allocation4_spill]] %s3173_s1 }
   0x3   :  { %3226 = sst [smem:[#allocation5_spill]] %s3174_s2 }
   0x4   :  { %3227 = sst [smem:[#allocation6_spill]] %s3175_s3 }
   0x5   :  { %3228 = sst [smem:[#allocation7_spill]] %s3176_s4 }
   0x6   :  { %3229 = sst [smem:[#allocation8_spill]] %s3177_s5 }
   0x7   :  { %3230 = sst [smem:[#allocation9_spill]] %s3178_s6 }
   0x8   :  { %3231 = sst [smem:[#allocation10_spill]] %s3179_s7 }
   0x9   :  { %3232 = sst [smem:[#allocation11_spill]] %s3180_s8 }
   0xa   :  { %3233 = sst [smem:[#allocation12_spill]] %s3181_s9 }
   0xb   :  { %3234 = sst [smem:[#allocation13_spill]] %s3186_s14 }
   0xc   :  { %3235 = sst [smem:[#allocation14_spill]] %s3187_s15 }
   0xd   :  { %3236 = sst [smem:[#allocation15_spill]] %s3195_s23 }
   0xe   :  { %3237 = sst [smem:[#allocation16_spill]] %s3196_s24 }
   0xf   :  { %3238 = sst [smem:[#allocation17_spill]] %s3197_s25 }
  0x10 LB: > { %3239 = sst [smem:[#allocation2_spill]] %s2622_s29  ;;  %s2235_s2 = sadd.s32 4294967295, %s2622_s29   ;;  %s2622_s29 = sphi %s2769_s29, %s35_s29  }
  0x11   : > { %p2239_p0 = scmp.ge.s32.totalorder %s2622_s29, 1  ;;  %p695_p1 = scmp.lt.s32.totalorder %s2622_s29, 3 }
  0x13   : > { %p696_p2 = pnand %p2239_p0, %p695_p1 }
  0x14   : > { %p765_p3 = scmp.lt.s32.totalorder (!%p696_p2), %s2235_s2, 1  ;;  %s3240_s3 = sld [smem:[#allocation3_spill]] (!%p696_p2) }
  0x15   : > { %699 = sbr.rel (%p696_p2) target bundleno = 5211 (0x145b), region = 120  ;;  %s3241_s27 = sld [smem:[#allocation6_spill]] (!%p696_p2) }
  0x16   : > { %s3242_s0 = sld [smem:[#allocation4_spill]] (!%p696_p2)  ;;  %s3215_s8 = smov (!%p696_p2), 64  }
  0x17   : > { %s3243_s7 = sld [smem:[#allocation5_spill]] (!%p696_p2)  ;;  %s3220_s4 = smov (!%p696_p2), 120  }
  0x18   : > { %s3244_s1 = sld [smem:[#allocation7_spill]] (!%p696_p2)  ;;  %s3216_s28 = smov (!%p696_p2), 96  }
  0x19   : > { %s3208_s9 = smov (!%p696_p2), 80   ;;  %s3219_s5 = smov (!%p696_p2), 88  }
  0x1a   : > { %s3273_s2 = smov (!%p765_p3, %s2235_s2), 1  ;;  %vm786_vm0 = vcmask 261120   ;;  %v2624_v2 = vmov 32.0   ;;  %vm864_vm5 = vcmask 64512   ;;  %v778_v40 = vlaneseq  ;;  %s3214_s30 = smov 72  }
  0x1b   : > { %s2777_s6 = sshll.u32 %s3273_s2, 3  ;;  %2566 = vrcp.f32 %v2624_v2  ;;  %v2480_v14 = vld [vmem:[%s3241_s27 + $0x8] sm:$0xff]  ;;  %v2479_v15 = vld [vmem:[%s3241_s27] sm:$0xff]  ;;  %s3213_s2 = smov 56   ;;  %vm1138_vm7 = vcmask 130048   ;;  %vm1140_vm8 = vcmask 195584  }
  0x1c   : > { %s768_s26 = scalar_lea.vmem %s3240_s3, %s2777_s6  ;;  %854 = vmatpush.bf16.msra.mxu1 %v2480_v14  ;;  %v2543_v25 = vld [vmem:[%s3242_s0] ss:$0 sm:$0xff]  ;;  %v779_v41 = vshrl.u32 %v778_v40, 7  ;;  %v781_v42 = vand.u32 127, %v778_v40  ;;  %s3207_s3 = smov 112  }
  0x1d   : > { %v2783_v0 = vld [vmem:[%s768_s26] sm:$0xff]  ;;  %s3212_s26 = smov 104   ;;  %s3252_s23 = smov 120  }
  0x1e   : > { %v787_v1 = vsel %vm786_vm0, %v2783_v0, 0.0  ;;  %v2544_v28 = vld [vmem:[%s3243_s7] ss:$0 sm:$0xff]  ;;  %vm2826_vm6 = vcmp.le.s32.totalorder %v781_v42, %v779_v41  ;;  %s3254_s25 = smov 96   ;;  %s3255_s29 = smov 64  }
  0x1f   : > { %788 = vadd.xlane.f32.xlu0 %v787_v1  ;;  %v2545_v32 = vld [vmem:[%s3244_s1] ss:$0 sm:$0xff]  ;;  %s3258_s24 = smov 104   ;;  %s3260_s14 = smov 112  }
  0x20   : > { %855 = vmatpush.bf16.msra.mxu1 %v2479_v15  ;;  %s3261_s15 = smov 48  }
  0x21   : > { %v2567_v3 = vpop.eup %2566 }
  0x22   : > { %v791_v4 = vmul.f32 32.0, %v2567_v3  ;;  %vm795_vm1 = vweird.f32 %v2567_v3 }
  0x24   : > { %v792_v5 = vsub.f32 1.0, %v791_v4 }
  0x26   : > { %v793_v6 = vmul.f32 %v2567_v3, %v792_v5 }
  0x28   : > { %v794_v7 = vadd.f32 %v2567_v3, %v793_v6 }
  0x2a   : > { %v2787_v8 = vsel %vm795_vm1, %v2567_v3, %v794_v7 }
  0x92   : > { %v789_v9 = vpop.xlane.xlu0 %788 }
  0x93   : > { %v797_v10 = vmul.f32 %v2787_v8, %v789_v9 }
  0x95   : > { %v798_v11 = vsub.f32 %v2783_v0, %v797_v10 }
  0x97   : > { %v799_v12 = vmul.f32 %v798_v11, %v798_v11 }
  0x99   : > { %v800_v13 = vsel %vm786_vm0, %v799_v12, 0.0 }
  0x9a   : > { %801 = vadd.xlane.f32.xlu0 %v800_v13 }
 0x10d   : > { %v802_v16 = vpop.xlane.xlu0 %801 }
 0x10e   : > { %v803_v17 = vmul.f32 %v802_v16, %v2787_v8 }
 0x110   : > { %v804_v18 = vadd.f32 1e-05, %v803_v17 }
 0x112   : > { %2568 = vrsqrt.f32 %v804_v18  ;;  %vm811_vm3 = vweird.f32 %v804_v18 }
 0x118   : > { %v2569_v19 = vpop.eup %2568 }
 0x119   : > { %v806_v20 = vmul.f32 %v2569_v19, %v804_v18  ;;  %vm812_vm2 = vweird.f32 %v2569_v19 }
 0x11a   : > { %vm813_vm4 = vmor %vm811_vm3, %vm812_vm2 }
 0x11b   : > { %v807_v21 = vmul.f32 %v2569_v19, %v806_v20 }
 0x11d   : > { %v808_v22 = vmul.f32 0.5, %v807_v21 }
 0x11f   : > { %v809_v23 = vsub.f32 1.5, %v808_v22 }
 0x121   : > { %v810_v24 = vmul.f32 %v2569_v19, %v809_v23 }
 0x123   : > { %v814_v26 = vsel %vm813_vm4, %v2569_v19, %v810_v24 }
 0x124   : > { %v815_v27 = vmul.f32 %v814_v26, %v798_v11 }
 0x126   : > { %v819_v29 = vmul.f32 %v2543_v25, %v815_v27 }
 0x128   : > { %v823_v30 = vadd.f32 %v2544_v28, %v819_v29 }
 0x12a   : > { %v828_v31 = vpack.c.bf16 %v823_v30, %v823_v30 }
 0x12c   : > { %2251 = vmatmul.msk.bf16.vlgmr.msra.gmra.mxu1 %vm786_vm0, %v828_v31 }
 0x1a9   : > { %v857_v33 = vpop.f32.mrf.mxu1 }
 0x1aa   : > { %v2809_v34 = vadd.f32 %v2545_v32, %v857_v33 }
 0x1ac   : > { %901 = vrot.lane.b32.xlu0 %v2809_v34, %s3215_s8  ;;  %927 = vrot.lane.b32.xlu2 %v2809_v34, %s3220_s4  ;;  %s3251_s8 = sld [smem:[#allocation11_spill]]  ;;  %s3259_s4 = smov 80  }
 0x1ad   : > { %862 = vrot.lane.b32.xlu1 %v2809_v34, %s3216_s28  ;;  %s3256_s28 = smov 72  }
 0x1b1   : > { %v859_v35 = vpop.f32.mrf.mxu1 }
 0x1b4   : > { %995 = vrot.lane.b32.xlu0 %v2809_v34, %s3208_s9  ;;  %s3210_s9 = smov 8  }
 0x1b5   : > { %929 = vrot.lane.b32.xlu1 %v2809_v34, %s3219_s5  ;;  %s3250_s5 = sld [smem:[#allocation10_spill]] }
 0x206   : > { %v928_v39 = vpop.permute.xlu2 %927 }
 0x21e   : > { %v902_v36 = vpop.permute.xlu0 %901 }
 0x21f   : > { %v863_v37 = vpop.permute.xlu1 %862  ;;  %922 = vmatpush.msra.mxu2 %v902_v36 }
 0x220   : > { %2252 = vmatpush.xpose.msk.msrb.mxu1 %vm864_vm5, %v863_v37 }
 0x223   : > { %2253 = vmatmul.msk.f32.vlgmr.msrb.gmra.mxu1 %vm864_vm5, %v2809_v34 }
 0x226   : > { %v996_v53 = vpop.permute.xlu0 %995 }
 0x227   : > { %v930_v38 = vpop.permute.xlu1 %929 }
 0x228   : > { %2255 = vmatpush.xpose.msk.msra.mxu3 %vm864_vm5, %v930_v38 }
 0x22b   : > { %2256 = vmatmul.msk.f32.vlgmr.msra.gmra.mxu3 %vm864_vm5, %v928_v39 }
 0x2a0   : > { %v886_v44 = vpop.f32.mrf.mxu1 }
 0x2a1   : > { %v889_v45 = vsel %vm2826_vm6, %v886_v44, -1e+30 }
 0x2a2   : > { %v890_v46 = vsel %vm864_vm5, %v889_v45, -inf }
 0x2a3   : > { %891 = vmax.xlane.f32.xlu2 %v890_v46 }
 0x2ae   : > { %v952_v47 = vpop.f32.mrf.mxu3 }
 0x2af   : > { %v955_v48 = vsel %vm2826_vm6, %v952_v47, -1e+30 }
 0x2b0   : > { %v956_v49 = vsel %vm864_vm5, %v955_v48, -inf }
 0x2b1   : > { %957 = vmax.xlane.f32.xlu0 %v956_v49 }
 0x2bb   : > { %967 = vrot.lane.b32.xlu2 %v2809_v34, %s3213_s2  ;;  %s3249_s2 = sld [smem:[#allocation12_spill]] }
 0x2c5   : > { %1061 = vrot.lane.b32.xlu0 %v2809_v34, %s3214_s30  ;;  %s3247_s30 = sld [smem:[#allocation8_spill]] }
 0x2cb   : > { %v2481_v38 = vld [vmem:[%s3247_s30] sm:$0xff] }
 0x316   : > { %v892_v50 = vpop.xlane.xlu2 %891 }
 0x317   : > { %v893_v51 = vsub.f32 %v889_v45, %v892_v50 }
 0x319   : > { %v894_v52 = vmul.f32 1.442695, %v893_v51 }
 0x31b   : > { %2570 = vpow2.f32 %v894_v52 }
 0x31e   : > { %v968_v54 = vpop.permute.xlu2 %967 }
 0x31f   : > { %988 = vmatpush.msrb.mxu2 %v968_v54 }
 0x321   : > { %v2571_v55 = vpop.eup %2570 }
 0x322   : > { %v896_v56 = vsel %vm864_vm5, %v2571_v55, 0.0 }
 0x323   : > { %897 = vadd.xlane.f32.xlu1 %v896_v56 }
 0x324   : > { %v958_v57 = vpop.xlane.xlu0 %957 }
 0x325   : > { %v959_v58 = vsub.f32 %v955_v48, %v958_v57 }
 0x327   : > { %v960_v59 = vmul.f32 1.442695, %v959_v58  ;;  %v2483_v58 = vld [vmem:[%s3249_s2] sm:$0xff] }
 0x329   : > { %2572 = vpow2.f32 %v960_v59  ;;  %v2492_v59 = vld [vmem:[%s3183_s11 + $0x38] sm:$0xff] }
 0x32f   : > { %v2573_v60 = vpop.eup %2572 }
 0x330   : > { %v962_v61 = vsel %vm864_vm5, %v2573_v60, 0.0 }
 0x331   : > { %963 = vadd.xlane.f32.xlu0 %v962_v61 }
 0x337   : > { %v1062_v63 = vpop.permute.xlu0 %1061 }
 0x33c   : > { %993 = vrot.lane.b32.xlu1 %v2809_v34, %s3207_s3  ;;  %s3209_s3 = smov 48  }
 0x345   : > { %1059 = vrot.lane.b32.xlu0 %v2809_v34, %s3212_s26  ;;  %s3257_s26 = smov 56  }
 0x396   : > { %v898_v62 = vpop.xlane.xlu1 %897 }
 0x397   : > { %2574 = vrcp.f32 %v898_v62  ;;  %v2491_v62 = vld [vmem:[%s3183_s11 + $0x30] sm:$0xff] }
 0x39d   : > { %v2575_v1 = vpop.eup %2574 }
 0x39e   : > { %v900_v2 = vmul.f32 %v2575_v1, %v2571_v55 }
 0x3a0   : > { %2254 = vmatmul.msk.f32.vlgmr.msra.gmra.mxu2 %vm864_vm5, %v900_v2 }
 0x3a1   : > { %2258 = vmatpush.xpose.msk.msra.mxu2 %vm864_vm5, %v996_v53 }
 0x3a4   : > { %v964_v3 = vpop.xlane.xlu0 %963 }
 0x3a5   : > { %2576 = vrcp.f32 %v964_v3 }
 0x3ab   : > { %v2577_v4 = vpop.eup %2576 }
 0x3ac   : > { %v966_v5 = vmul.f32 %v2577_v4, %v2573_v60 }
 0x3ae   : > { %2257 = vmatmul.msk.f32.vlgmr.msrb.gmra.mxu2 %vm864_vm5, %v966_v5  ;;  %v994_v6 = vpop.permute.xlu1 %993 }
 0x3af   : > { %2261 = vmatpush.xpose.msk.msrb.mxu2 %vm864_vm5, %v1062_v63 }
 0x3b6   : > { %2259 = vmatmul.msk.f32.vlgmr.msra.gmra.mxu2 %vm864_vm5, %v994_v6 }
 0x3b7   : > { %v1060_v7 = vpop.permute.xlu0 %1059  ;;  %1324 = vmatpush.bf16.msra.mxu2 %v2492_v59 }
 0x3bb   : > { %1325 = vmatpush.bf16.msra.mxu2 %v2491_v62 }
 0x3be   : > { %2262 = vmatmul.msk.f32.vlgmr.msrb.gmra.mxu2 %vm864_vm5, %v1060_v7  ;;  %v2547_v7 = vld [vmem:[%s3250_s5] ss:$0 sm:$0xff] }
 0x423   : > { %v924_v9 = vpop.f32.mrf.mxu2 }
 0x431   : > { %v990_v10 = vpop.f32.mrf.mxu2 }
 0x439   : > { %v1018_v11 = vpop.f32.mrf.mxu2 }
 0x43a   : > { %v1021_v12 = vsel %vm2826_vm6, %v1018_v11, -1e+30  ;;  %v2548_v11 = vld [vmem:[%s3251_s8] ss:$0 sm:$0xff] }
 0x43b   : > { %v1022_v13 = vsel %vm864_vm5, %v1021_v12, -inf }
 0x43c   : > { %1023 = vmax.xlane.f32.xlu2 %v1022_v13 }
 0x441   : > { %v1084_v14 = vpop.f32.mrf.mxu2 }
 0x442   : > { %v1087_v15 = vsel %vm2826_vm6, %v1084_v14, -1e+30 }
 0x443   : > { %v1088_v16 = vsel %vm864_vm5, %v1087_v15, -inf }
 0x444   : > { %1089 = vmax.xlane.f32.xlu0 %v1088_v16  ;;  %v2489_v16 = vld [vmem:[%s3183_s11 + $0x20] sm:$0xff] }
 0x458   : > { %1033 = vrot.lane.b32.xlu0 %v2809_v34, %s3209_s3  ;;  %s3211_s3 = smov 40  }
 0x4af   : > { %v1024_v17 = vpop.xlane.xlu2 %1023 }
 0x4b0   : > { %v1025_v18 = vsub.f32 %v1021_v12, %v1024_v17  ;;  %v2488_v17 = vld [vmem:[%s3183_s11 + $0x18] sm:$0xff] }
 0x4b2   : > { %v1026_v19 = vmul.f32 1.442695, %v1025_v18  ;;  %v2487_v18 = vld [vmem:[%s3183_s11 + $0x10] sm:$0xff] }
 0x4b4   : > { %2578 = vpow2.f32 %v1026_v19  ;;  %v2486_v19 = vld [vmem:[%s3183_s11 + $0x8] sm:$0xff] }
 0x4b7   : > { %v1090_v20 = vpop.xlane.xlu0 %1089 }
 0x4b8   : > { %v1091_v21 = vsub.f32 %v1087_v15, %v1090_v20  ;;  %v2490_v15 = vld [vmem:[%s3183_s11 + $0x28] sm:$0xff]  ;;  %v2485_v20 = vld [vmem:[%s3183_s11] sm:$0xff] }
 0x4b9   : > { %1326 = vmatpush.bf16.msra.mxu2 %v2490_v15 }
 0x4ba   : > { %v2579_v22 = vpop.eup %2578  ;;  %v1092_v23 = vmul.f32 1.442695, %v1091_v21  ;;  %v2549_v21 = vld [vmem:[%s3182_s10] ss:$0 sm:$0xff] }
 0x4bb   : > { %v1028_v24 = vsel %vm864_vm5, %v2579_v22, 0.0 }
 0x4bc   : > { %2580 = vpow2.f32 %v1092_v23  ;;  %1029 = vadd.xlane.f32.xlu1 %v1028_v24 }
 0x4bd   : > { %1327 = vmatpush.bf16.msra.mxu2 %v2489_v16 }
 0x4c1   : > { %1328 = vmatpush.bf16.msra.mxu2 %v2488_v17 }
 0x4c2   : > { %v2581_v25 = vpop.eup %2580 }
 0x4c3   : > { %v1094_v26 = vsel %vm864_vm5, %v2581_v25, 0.0 }
 0x4c4   : > { %1095 = vadd.xlane.f32.xlu2 %v1094_v26 }
 0x4c5   : > { %1329 = vmatpush.bf16.msra.mxu2 %v2487_v18 }
 0x4c9   : > { %1330 = vmatpush.bf16.msra.mxu2 %v2486_v19 }
 0x4ca   : > { %v1034_v27 = vpop.permute.xlu0 %1033 }
 0x4cb   : > { %1054 = vmatpush.msrb.mxu3 %v1034_v27 }
 0x4cd   : > { %1331 = vmatpush.bf16.msra.mxu2 %v2485_v20 }
 0x4d5   : > { %1126 = vrot.lane.b32.xlu1 %v990_v10, %s3210_s9  ;;  %s3218_s9 = smov 16  }
 0x4dc   : > { %1099 = vrot.lane.b32.xlu2 %v2809_v34, %s3211_s3  ;;  %s3217_s3 = smov 24   ;;  %v2482_v34 = vld [vmem:[%s3247_s30 + $0x8] sm:$0xff] }
 0x4dd   : > { %1168 = vmatpush.bf16.msra.mxu3 %v2482_v34 }
 0x4e1   : > { %1169 = vmatpush.bf16.msra.mxu3 %v2481_v38 }
 0x52f   : > { %v1030_v28 = vpop.xlane.xlu1 %1029 }
 0x530   : > { %2582 = vrcp.f32 %v1030_v28 }
 0x536   : > { %v2583_v29 = vpop.eup %2582 }
 0x537   : > { %v1096_v30 = vpop.xlane.xlu2 %1095  ;;  %v1032_v31 = vmul.f32 %v2583_v29, %v2579_v22 }
 0x538   : > { %2584 = vrcp.f32 %v1096_v30 }
 0x539   : > { %2260 = vmatmul.msk.f32.vlgmr.msrb.gmra.mxu3 %vm864_vm5, %v1032_v31 }
 0x53e   : > { %v2585_v32 = vpop.eup %2584 }
 0x53f   : > { %v1098_v33 = vmul.f32 %v2585_v32, %v2581_v25  ;;  %v1100_v35 = vpop.permute.xlu2 %1099 }
 0x540   : > { %1120 = vmatpush.msra.mxu1 %v1100_v35 }
 0x541   : > { %2263 = vmatmul.msk.f32.vlgmr.msra.gmra.mxu1 %vm864_vm5, %v1098_v33 }
 0x547   : > { %v1127_v40 = vpop.permute.xlu1 %1126 }
 0x548   : > { %v1137_v41 = vsel %vm864_vm5, %v924_v9, %v1127_v40 }
 0x5bc   : > { %v1056_v36 = vpop.f32.mrf.mxu3 }
 0x5bd   : > { %1130 = vrot.lane.b32.xlu0 %v1056_v36, %s3218_s9  ;;  %v2550_v36 = vld [vmem:[%s3184_s12] ss:$0 sm:$0xff]  ;;  %s3253_s9 = smov 88  }
 0x5be   : > { %v1122_v37 = vpop.f32.mrf.mxu1 }
 0x5c5   : > { %1134 = vrot.lane.b32.xlu0 %v1122_v37, %s3217_s3  ;;  %s3248_s3 = sld [smem:[#allocation9_spill]] }
 0x5cb   : > { %v2546_v47 = vld [vmem:[%s3248_s3] ss:$0 sm:$0xff] }
 0x62f   : > { %v1131_v39 = vpop.permute.xlu0 %1130 }
 0x630   : > { %v1139_v42 = vsel %vm1138_vm7, %v1137_v41, %v1131_v39 }
 0x637   : > { %v1135_v44 = vpop.permute.xlu0 %1134 }
 0x638   : > { %v1141_v45 = vsel %vm1140_vm8, %v1139_v42, %v1135_v44 }
 0x639   : > { %v1146_v46 = vpack.c.bf16 %v1141_v45, %v1141_v45 }
 0x63b   : > { %2272 = vmatmul.msk.bf16.vlgmr.msra.gmra.mxu3 %vm786_vm0, %v1146_v46 }
 0x6be   : > { %v1171_v48 = vpop.f32.mrf.mxu3 }
 0x6bf   : > { %v1175_v49 = vadd.f32 %v1171_v48, %v2783_v0  ;;  %v2484_v0 = vld [vmem:[%s3249_s2 + $0x8] sm:$0xff]  ;;  %v2493_v48 = vld [vmem:[%s3241_s27 + $0x10] sm:$0xff] }
 0x6c0   : > { %1243 = vmatpush.bf16.msrb.mxu3 %v2484_v0  ;;  %v2551_v0 = vld [vmem:[%s3242_s0 + $0x1] ss:$0 sm:$0xff]  ;;  %s3269_s0 = sld [smem:[#allocation16_spill]] }
 0x6c1   : > { %v2883_v50 = vadd.f32 %v2546_v47, %v1175_v49  ;;  %v2494_v47 = vld [vmem:[%s3241_s27 + $0x18] sm:$0xff] }
 0x6c2   : > { %1409 = vmatpush.bf16.msrb.mxu1 %v2494_v47 }
 0x6c3   : > { %v1183_v51 = vsel %vm786_vm0, %v2883_v50, 0.0 }
 0x6c4   : > { %1184 = vadd.xlane.f32.xlu2 %v1183_v51  ;;  %1244 = vmatpush.bf16.msrb.mxu3 %v2483_v58 }
 0x6c6   : > { %v1173_v52 = vpop.f32.mrf.mxu3  ;;  %1410 = vmatpush.bf16.msrb.mxu1 %v2493_v48 }
 0x737   : > { %v1185_v53 = vpop.xlane.xlu2 %1184 }
 0x738   : > { %v1186_v54 = vmul.f32 %v1185_v53, %v2787_v8 }
 0x73a   : > { %v1187_v55 = vsub.f32 %v2883_v50, %v1186_v54 }
 0x73c   : > { %v1188_v56 = vmul.f32 %v1187_v55, %v1187_v55 }
 0x73e   : > { %v1189_v57 = vsel %vm786_vm0, %v1188_v56, 0.0 }
 0x73f   : > { %1190 = vadd.xlane.f32.xlu1 %v1189_v57 }
 0x7b2   : > { %v1191_v60 = vpop.xlane.xlu1 %1190 }
 0x7b3   : > { %v1192_v61 = vmul.f32 %v1191_v60, %v2787_v8  ;;  %v2552_v60 = vld [vmem:[%s3243_s7 + $0x1] ss:$0 sm:$0xff] }
 0x7b5   : > { %v1193_v63 = vadd.f32 1e-05, %v1192_v61 }
 0x7b7   : > { %2586 = vrsqrt.f32 %v1193_v63  ;;  %vm1200_vm10 = vweird.f32 %v1193_v63 }
 0x7bd   : > { %v2587_v1 = vpop.eup %2586 }
 0x7be   : > { %v1195_v2 = vmul.f32 %v2587_v1, %v1193_v63  ;;  %vm1201_vm9 = vweird.f32 %v2587_v1 }
 0x7bf   : > { %vm1202_vm11 = vmor %vm1200_vm10, %vm1201_vm9 }
 0x7c0   : > { %v1196_v3 = vmul.f32 %v2587_v1, %v1195_v2 }
 0x7c2   : > { %v1197_v4 = vmul.f32 0.5, %v1196_v3 }
 0x7c4   : > { %v1198_v5 = vsub.f32 1.5, %v1197_v4 }
 0x7c6   : > { %v1199_v6 = vmul.f32 %v2587_v1, %v1198_v5 }
 0x7c8   : > { %v1203_v9 = vsel %vm1202_vm11, %v2587_v1, %v1199_v6  ;;  %v2553_v1 = vld [vmem:[%s3244_s1 + $0x1] ss:$0 sm:$0xff] }
 0x7c9   : > { %v1204_v10 = vmul.f32 %v1203_v9, %v1187_v55 }
 0x7cb   : > { %v1208_v12 = vmul.f32 %v2547_v7, %v1204_v10 }
 0x7cd   : > { %v1212_v13 = vadd.f32 %v2548_v11, %v1208_v12 }
 0x7cf   : > { %v1217_v14 = vpack.c.bf16 %v1212_v13, %v1212_v13 }
 0x7d1   : > { %2281 = vmatmul.msk.bf16.vlgmr.msrb.gmra.mxu3 %vm786_vm0, %v1217_v14 }
 0x854   : > { %v1246_v22 = vpop.f32.mrf.mxu3 }
 0x855   : > { %v1247_v23 = vadd.f32 %v2549_v21, %v1246_v22 }
 0x857   : > { %v1251_v24 = vmul.f32 0.044715, %v1247_v23  ;;  %v1250_v31 = vmul.f32 0.5, %v1247_v23 }
 0x859   : > { %v1252_v25 = vmul.f32 %v1251_v24, %v1247_v23 }
 0x85b   : > { %v1253_v26 = vmul.f32 %v1252_v25, %v1247_v23 }
 0x85c   : > { %v1248_v27 = vpop.f32.mrf.mxu3 }
 0x85d   : > { %v1254_v28 = vadd.f32 %v1253_v26, %v1247_v23 }
 0x85f   : > { %v1255_v29 = vmul.f32 0.7978846, %v1254_v28 }
 0x861   : > { %2588 = vtanh.f32 %v1255_v29 }
 0x867   : > { %v2589_v30 = vpop.eup %2588 }
 0x868   : > { %v1257_v32 = vadd.f32 1.0, %v2589_v30 }
 0x86a   : > { %v1258_v33 = vmul.f32 %v1257_v32, %v1250_v31 }
 0x86c   : > { %v1275_v35 = vpack.c.bf16 %v1258_v33, %v1258_v33 }
 0x86e   : > { %1332 = vmatmul.bf16.vlgmr.msra.gmra.mxu2 %v1275_v35 }
 0x8f1   : > { %v1333_v37 = vpop.f32.mrf.mxu2 }
 0x8f2   : > { %v1337_v34 = vadd.f32 %v1333_v37, %v2883_v50 }
 0x8f4   : > { %v2935_v38 = vadd.f32 %v2550_v36, %v1337_v34 }
 0x8f6   : > { %v1347_v39 = vsel %vm786_vm0, %v2935_v38, 0.0 }
 0x8f7   : > { %1348 = vadd.xlane.f32.xlu0 %v1347_v39 }
 0x8f9   : > { %v1335_v40 = vpop.f32.mrf.mxu2 }
 0x96a   : > { %v1349_v41 = vpop.xlane.xlu0 %1348 }
 0x96b   : > { %v1350_v42 = vmul.f32 %v1349_v41, %v2787_v8 }
 0x96d   : > { %v1351_v44 = vsub.f32 %v2935_v38, %v1350_v42 }
 0x96f   : > { %v1352_v45 = vmul.f32 %v1351_v44, %v1351_v44 }
 0x971   : > { %v1353_v46 = vsel %vm786_vm0, %v1352_v45, 0.0 }
 0x972   : > { %1354 = vadd.xlane.f32.xlu2 %v1353_v46 }
 0x9e5   : > { %v1355_v49 = vpop.xlane.xlu2 %1354 }
 0x9e6   : > { %v1356_v50 = vmul.f32 %v1355_v49, %v2787_v8 }
 0x9e8   : > { %v1357_v51 = vadd.f32 1e-05, %v1356_v50 }
 0x9ea   : > { %2590 = vrsqrt.f32 %v1357_v51  ;;  %vm1364_vm13 = vweird.f32 %v1357_v51 }
 0x9f0   : > { %v2591_v52 = vpop.eup %2590 }
 0x9f1   : > { %v1359_v53 = vmul.f32 %v2591_v52, %v1357_v51  ;;  %vm1365_vm12 = vweird.f32 %v2591_v52 }
 0x9f2   : > { %vm1366_vm14 = vmor %vm1364_vm13, %vm1365_vm12 }
 0x9f3   : > { %v1360_v54 = vmul.f32 %v2591_v52, %v1359_v53 }
 0x9f5   : > { %v1361_v55 = vmul.f32 0.5, %v1360_v54 }
 0x9f7   : > { %v1362_v56 = vsub.f32 1.5, %v1361_v55 }
 0x9f9   : > { %v1363_v57 = vmul.f32 %v2591_v52, %v1362_v56 }
 0x9fb   : > { %v1367_v58 = vsel %vm1366_vm14, %v2591_v52, %v1363_v57 }
 0x9fc   : > { %v1368_v59 = vmul.f32 %v1367_v58, %v1351_v44 }
 0x9fe   : > { %v1372_v61 = vmul.f32 %v2551_v0, %v1368_v59 }
 0xa00   : > { %v1376_v62 = vadd.f32 %v2552_v60, %v1372_v61 }
 0xa02   : > { %v1382_v63 = vpack.c.bf16 %v1376_v62, %v1376_v62 }
 0xa04   : > { %2329 = vmatmul.msk.bf16.vlgmr.msrb.gmra.mxu1 %vm786_vm0, %v1382_v63 }
 0xa81   : > { %v1412_v2 = vpop.f32.mrf.mxu1 }
 0xa82   : > { %v2959_v3 = vadd.f32 %v2553_v1, %v1412_v2  ;;  %v2496_v2 = vld [vmem:[%s3247_s30 + $0x18] sm:$0xff] }
 0xa84   : > { %1481 = vrot.lane.b32.xlu0 %v2959_v3, %s3252_s23  ;;  %1483 = vrot.lane.b32.xlu2 %v2959_v3, %s3253_s9  ;;  %s3262_s23 = smov 8   ;;  %s3263_s9 = smov 40  }
 0xa85   : > { %1417 = vrot.lane.b32.xlu1 %v2959_v3, %s3254_s25  ;;  %s3264_s25 = smov 16  }
 0xa89   : > { %v1414_v4 = vpop.f32.mrf.mxu1 }
 0xa8c   : > { %1455 = vrot.lane.b32.xlu2 %v2959_v3, %s3255_s29  ;;  %s3265_s29 = smov 24  }
 0xade   : > { %v1484_v5 = vpop.permute.xlu2 %1483 }
 0xadf   : > { %2333 = vmatpush.xpose.msk.msra.mxu1 %vm864_vm5, %v1484_v5 }
 0xae6   : > { %v1456_v6 = vpop.permute.xlu2 %1455 }
 0xae7   : > { %1476 = vmatpush.msra.mxu0 %v1456_v6 }
 0xaf6   : > { %v1482_v7 = vpop.permute.xlu0 %1481 }
 0xaf7   : > { %v1418_v9 = vpop.permute.xlu1 %1417  ;;  %2334 = vmatmul.msk.f32.vlgmr.msra.gmra.mxu1 %vm864_vm5, %v1482_v7 }
 0xaf8   : > { %2330 = vmatpush.xpose.msk.msra.mxu3 %vm864_vm5, %v1418_v9 }
 0xafb   : > { %2331 = vmatmul.msk.f32.vlgmr.msra.gmra.mxu3 %vm864_vm5, %v2959_v3 }
 0xb74   : > { %v1506_v10 = vpop.f32.mrf.mxu1 }
 0xb75   : > { %v1509_v11 = vsel %vm2826_vm6, %v1506_v10, -1e+30 }
 0xb76   : > { %v1510_v12 = vsel %vm864_vm5, %v1509_v11, -inf }
 0xb77   : > { %1511 = vmax.xlane.f32.xlu0 %v1510_v12  ;;  %v2554_v12 = vld [vmem:[%s3248_s3 + $0x1] ss:$0 sm:$0xff] }
 0xb7e   : > { %v1440_v13 = vpop.f32.mrf.mxu3 }
 0xb7f   : > { %v1443_v14 = vsel %vm2826_vm6, %v1440_v13, -1e+30 }
 0xb80   : > { %v1444_v15 = vsel %vm864_vm5, %v1443_v14, -inf }
 0xb81   : > { %1445 = vmax.xlane.f32.xlu1 %v1444_v15 }
 0xb8b   : > { %1615 = vrot.lane.b32.xlu0 %v2959_v3, %s3256_s28  ;;  %s772_s28 = scalar_lea.vmem %s3188_s16, %s2777_s6 }
 0xb9a   : > { %1521 = vrot.lane.b32.xlu1 %v2959_v3, %s3257_s26 }
 0xba2   : > { %1613 = vrot.lane.b32.xlu1 %v2959_v3, %s3258_s24 }
 0xbea   : > { %v1512_v16 = vpop.xlane.xlu0 %1511 }
 0xbeb   : > { %v1513_v17 = vsub.f32 %v1509_v11, %v1512_v16 }
 0xbed   : > { %v1514_v18 = vmul.f32 1.442695, %v1513_v17 }
 0xbef   : > { %2592 = vpow2.f32 %v1514_v18 }
 0xbf4   : > { %v1446_v19 = vpop.xlane.xlu1 %1445 }
 0xbf5   : > { %v2593_v20 = vpop.eup %2592  ;;  %v1447_v21 = vsub.f32 %v1443_v14, %v1446_v19 }
 0xbf6   : > { %v1516_v22 = vsel %vm864_vm5, %v2593_v20, 0.0 }
 0xbf7   : > { %v1448_v23 = vmul.f32 1.442695, %v1447_v21  ;;  %1517 = vadd.xlane.f32.xlu2 %v1516_v22 }
 0xbf9   : > { %2594 = vpow2.f32 %v1448_v23  ;;  %v2497_v23 = vld [vmem:[%s3249_s2 + $0x10] sm:$0xff] }
 0xbfd   : > { %v1616_v27 = vpop.permute.xlu0 %1615 }
 0xbff   : > { %v2595_v24 = vpop.eup %2594 }
 0xc00   : > { %v1450_v25 = vsel %vm864_vm5, %v2595_v24, 0.0 }
 0xc01   : > { %1451 = vadd.xlane.f32.xlu0 %v1450_v25 }
 0xc0c   : > { %v1522_v26 = vpop.permute.xlu1 %1521 }
 0xc0d   : > { %1542 = vmatpush.msrb.mxu3 %v1522_v26 }
 0xc0f   : > { %2339 = vmatpush.xpose.msk.msra.mxu3 %vm864_vm5, %v1616_v27  ;;  %1549 = vrot.lane.b32.xlu2 %v2959_v3, %s3259_s4  ;;  %v2505_v27 = vld [vmem:[%s3183_s11 + $0x70] sm:$0xff]  ;;  %s3268_s4 = sld [smem:[#allocation15_spill]] }
 0xc14   : > { %v1614_v35 = vpop.permute.xlu1 %1613 }
 0xc15   : > { %1547 = vrot.lane.b32.xlu0 %v2959_v3, %s3260_s14  ;;  %s3266_s14 = sld [smem:[#allocation13_spill]] }
 0xc6a   : > { %v1518_v28 = vpop.xlane.xlu2 %1517 }
 0xc6b   : > { %2596 = vrcp.f32 %v1518_v28 }
 0xc71   : > { %v2597_v29 = vpop.eup %2596 }
 0xc72   : > { %v1520_v30 = vmul.f32 %v2597_v29, %v2593_v20  ;;  %v1550_v31 = vpop.permute.xlu2 %1549 }
 0xc73   : > { %2336 = vmatpush.xpose.msk.msrb.mxu0 %vm864_vm5, %v1550_v31 }
 0xc74   : > { %v1452_v32 = vpop.xlane.xlu0 %1451  ;;  %2335 = vmatmul.msk.f32.vlgmr.msrb.gmra.mxu3 %vm864_vm5, %v1520_v30 }
 0xc75   : > { %2598 = vrcp.f32 %v1452_v32 }
 0xc7b   : > { %v2599_v33 = vpop.eup %2598 }
 0xc7c   : > { %2340 = vmatmul.msk.f32.vlgmr.msra.gmra.mxu3 %vm864_vm5, %v1614_v35  ;;  %v1454_v36 = vmul.f32 %v2599_v33, %v2595_v24  ;;  %v2506_v24 = vld [vmem:[%s3183_s11 + $0x78] sm:$0xff] }
 0xc7d   : > { %1883 = vmatpush.bf16.msrb.mxu2 %v2506_v24 }
 0xc7e   : > { %2332 = vmatmul.msk.f32.vlgmr.msra.gmra.mxu0 %vm864_vm5, %v1454_v36  ;;  %v2555_v36 = vld [vmem:[%s3250_s5 + $0x1] ss:$0 sm:$0xff] }
 0xc81   : > { %1884 = vmatpush.bf16.msrb.mxu2 %v2505_v27 }
 0xc87   : > { %v1548_v37 = vpop.permute.xlu0 %1547 }
 0xc88   : > { %2337 = vmatmul.msk.f32.vlgmr.msrb.gmra.mxu0 %vm864_vm5, %v1548_v37 }
 0xcf7   : > { %v1544_v34 = vpop.f32.mrf.mxu3 }
 0xcfb   : > { %v1478_v39 = vpop.f32.mrf.mxu0 }
 0xcff   : > { %v1638_v40 = vpop.f32.mrf.mxu3 }
 0xd00   : > { %v1641_v41 = vsel %vm2826_vm6, %v1638_v40, -1e+30 }
 0xd01   : > { %v1642_v42 = vsel %vm864_vm5, %v1641_v41, -inf }
 0xd02   : > { %1643 = vmax.xlane.f32.xlu2 %v1642_v42 }
 0xd05   : > { %v1572_v44 = vpop.f32.mrf.mxu0 }
 0xd06   : > { %v1575_v45 = vsel %vm2826_vm6, %v1572_v44, -1e+30  ;;  %v2504_v44 = vld [vmem:[%s3183_s11 + $0x68] sm:$0xff] }
 0xd07   : > { %v1576_v46 = vsel %vm864_vm5, %v1575_v45, -inf  ;;  %1885 = vmatpush.bf16.msrb.mxu2 %v2504_v44  ;;  %v2563_v44 = vld [vmem:[%s3266_s14] ss:$0 sm:$0xff] }
 0xd08   : > { %1577 = vmax.xlane.f32.xlu1 %v1576_v46  ;;  %v2502_v46 = vld [vmem:[%s3183_s11 + $0x58] sm:$0xff] }
 0xd21   : > { %1587 = vrot.lane.b32.xlu1 %v2959_v3, %s3261_s15 }
 0xd75   : > { %v1644_v47 = vpop.xlane.xlu2 %1643 }
 0xd76   : > { %v1645_v48 = vsub.f32 %v1641_v41, %v1644_v47  ;;  %v2501_v47 = vld [vmem:[%s3183_s11 + $0x50] sm:$0xff] }
 0xd78   : > { %v1646_v49 = vmul.f32 1.442695, %v1645_v48  ;;  %v2500_v48 = vld [vmem:[%s3183_s11 + $0x48] sm:$0xff] }
 0xd7a   : > { %2600 = vpow2.f32 %v1646_v49  ;;  %v2499_v49 = vld [vmem:[%s3183_s11 + $0x40] sm:$0xff] }
 0xd7b   : > { %v1578_v50 = vpop.xlane.xlu1 %1577 }
 0xd7c   : > { %v1579_v51 = vsub.f32 %v1575_v45, %v1578_v50  ;;  %v2503_v45 = vld [vmem:[%s3183_s11 + $0x60] sm:$0xff] }
 0xd7d   : > { %1886 = vmatpush.bf16.msrb.mxu2 %v2503_v45  ;;  %v1935_v50 = vld [vmem:[%s772_s28] sm:$0xff] }
 0xd7e   : > { %v1580_v52 = vmul.f32 1.442695, %v1579_v51  ;;  %v2507_v51 = vld [vmem:[%s3189_s17] sm:$0xff] }
 0xd80   : > { %v2601_v53 = vpop.eup %2600  ;;  %2602 = vpow2.f32 %v1580_v52  ;;  %v1938_v52 = vpack.c.bf16 %v1935_v50, %v1935_v50 }
 0xd81   : > { %v1648_v54 = vsel %vm864_vm5, %v2601_v53, 0.0  ;;  %1887 = vmatpush.bf16.msrb.mxu2 %v2502_v46 }
 0xd82   : > { %1649 = vadd.xlane.f32.xlu2 %v1648_v54 }
 0xd85   : > { %1888 = vmatpush.bf16.msrb.mxu2 %v2501_v47 }
 0xd86   : > { %v2603_v43 = vpop.eup %2602 }
 0xd87   : > { %v1582_v55 = vsel %vm864_vm5, %v2603_v43, 0.0 }
 0xd88   : > { %1583 = vadd.xlane.f32.xlu0 %v1582_v55 }
 0xd89   : > { %1889 = vmatpush.bf16.msrb.mxu2 %v2500_v48 }
 0xd8d   : > { %1890 = vmatpush.bf16.msrb.mxu2 %v2499_v49 }
 0xd93   : > { %v1588_v56 = vpop.permute.xlu1 %1587 }
 0xd94   : > { %1608 = vmatpush.msrb.mxu1 %v1588_v56 }
 0xd96   : > { %1721 = vmatpush.bf16.msra.mxu1 %v2496_v2  ;;  %v2509_v2 = vld [vmem:[%s3191_s19 + $0x8] sm:$0xff] }
 0xd9a   : > { %1680 = vrot.lane.b32.xlu2 %v1544_v34, %s3262_s23  ;;  %s3267_s23 = sld [smem:[#allocation14_spill]] }
 0xd9c   : > { %1653 = vrot.lane.b32.xlu0 %v2959_v3, %s3263_s9  ;;  %v2495_v3 = vld [vmem:[%s3247_s30 + $0x10] sm:$0xff] }
 0xd9d   : > { %1722 = vmatpush.bf16.msra.mxu1 %v2495_v3  ;;  %v2558_v3 = vld [vmem:[%s3190_s18] ss:$0 sm:$0xff] }
 0xda0   : > { %v2519_v50 = vld [vmem:[%s3267_s23 + $0x38] sm:$0xff] }
 0xdf5   : > { %v1650_v58 = vpop.xlane.xlu2 %1649 }
 0xdfb   : > { %v1584_v57 = vpop.xlane.xlu0 %1583 }
 0xdfc   : > { %2604 = vrcp.f32 %v1584_v57 }
 0xdfd   : > { %2606 = vrcp.f32 %v1650_v58  ;;  %v1681_v4 = vpop.permute.xlu2 %1680 }
 0xdfe   : > { %v1691_v6 = vsel %vm864_vm5, %v1478_v39, %v1681_v4  ;;  %v2556_v39 = vld [vmem:[%s3251_s8 + $0x1] ss:$0 sm:$0xff] }
 0xe02   : > { %v2605_v0 = vpop.eup %2604 }
 0xe03   : > { %v1586_v59 = vmul.f32 %v2605_v0, %v2603_v43  ;;  %v2607_v60 = vpop.eup %2606 }
 0xe04   : > { %v1652_v61 = vmul.f32 %v2607_v60, %v2601_v53  ;;  %v2557_v53 = vld [vmem:[%s3182_s10 + $0x1] ss:$0 sm:$0xff] }
 0xe05   : > { %2338 = vmatmul.msk.f32.vlgmr.msrb.gmra.mxu1 %vm864_vm5, %v1586_v59 }
 0xe06   : > { %1995 = vmatpush.bf16.msrb.mxu1 %v2509_v2  ;;  %v2513_v2 = vld [vmem:[%s3267_s23 + $0x8] sm:$0xff] }
 0xe0e   : > { %v1654_v62 = vpop.permute.xlu0 %1653 }
 0xe0f   : > { %1674 = vmatpush.msra.mxu0 %v1654_v62 }
 0xe10   : > { %2341 = vmatmul.msk.f32.vlgmr.msra.gmra.mxu0 %vm864_vm5, %v1652_v61 }
 0xe11   : > { %1959 = vmatpush.bf16.msrb.mxu0 %v2507_v51  ;;  %v2154_v51 = vsel %vm786_vm0, %v2519_v50, 0 }
 0xe15   : > { %2156 = vmatpush.bf16.xpose.msra.mxu0 %v2154_v51 }
 0xe18   : > { %2425 = vmatmul.msk.bf16.vlgmr.msrb.gmra.mxu0 %vm1138_vm7, %v1938_v52  ;;  %v2518_v52 = vld [vmem:[%s3267_s23 + $0x30] sm:$0xff] }
 0xe82   : > { %v1610_v63 = vpop.f32.mrf.mxu1 }
 0xe83   : > { %1684 = vrot.lane.b32.xlu0 %v1610_v63, %s3264_s25 }
 0xe8d   : > { %v1676_v1 = vpop.f32.mrf.mxu0 }
 0xe8e   : > { %1688 = vrot.lane.b32.xlu1 %v1676_v1, %s3265_s29  ;;  %s3270_s29 = sld [smem:[#allocation17_spill]] }
 0xe94   : > { %s776_s28 = scalar_lea.vmem %s3270_s29, %s2777_s6 }
 0xe95   : > { %v1961_v4 = vpop.f32.mrf.mxu0 }
 0xef5   : > { %v1685_v5 = vpop.permute.xlu0 %1684 }
 0xef6   : > { %v1692_v7 = vsel %vm1138_vm7, %v1691_v6, %v1685_v5  ;;  %v2508_v5 = vld [vmem:[%s3191_s19] sm:$0xff]  ;;  %v1962_v6 = vadd.f32 %v2558_v3, %v1961_v4  ;;  %v2136_v3 = vsel %vm786_vm0, %v2513_v2, 0 }
 0xef7   : > { %1996 = vmatpush.bf16.msrb.mxu1 %v2508_v5  ;;  %v2512_v4 = vld [vmem:[%s3267_s23] sm:$0xff] }
 0xef8   : > { %v2133_v5 = vsel %vm786_vm0, %v2512_v4, 0 }
 0xf00   : > { %v1689_v9 = vpop.permute.xlu1 %1688 }
 0xf01   : > { %v1693_v10 = vsel %vm1140_vm8, %v1692_v7, %v1689_v9  ;;  %v1969_v7 = vpack.c.bf16 %v1962_v6, %v1962_v6  ;;  %v1963_v9 = vpop.f32.mrf.mxu0 }
 0xf02   : > { %v1699_v11 = vpack.c.bf16 %v1693_v10, %v1693_v10  ;;  %v2559_v10 = vld [vmem:[%s3184_s12 + $0x1] ss:$0 sm:$0xff] }
 0xf04   : > { %2354 = vmatmul.msk.bf16.vlgmr.msra.gmra.mxu1 %vm786_vm0, %v1699_v11 }
 0xf14   : > { %2434 = vmatmul.msk.bf16.vlgmr.msrb.gmra.mxu1 %vm786_vm0, %v1969_v7 }
 0xf81   : > { %v1724_v13 = vpop.f32.mrf.mxu1 }
 0xf82   : > { %v1728_v14 = vadd.f32 %v1724_v13, %v2935_v38  ;;  %v2498_v38 = vld [vmem:[%s3249_s2 + $0x18] sm:$0xff] }
 0xf83   : > { %1801 = vmatpush.bf16.msrb.mxu3 %v2498_v38 }
 0xf84   : > { %v3029_v15 = vadd.f32 %v2554_v12, %v1728_v14 }
 0xf86   : > { %v1739_v16 = vsel %vm786_vm0, %v3029_v15, 0.0 }
 0xf87   : > { %1740 = vadd.xlane.f32.xlu0 %v1739_v16  ;;  %1802 = vmatpush.bf16.msrb.mxu3 %v2497_v23 }
 0xf89   : > { %v1726_v17 = vpop.f32.mrf.mxu1 }
 0xf8a   : > { %v2511_v17 = vld [vmem:[%s3193_s21 + $0x8] sm:$0xff] }
 0xf8b   : > { %2032 = vmatpush.bf16.msra.mxu3 %v2511_v17  ;;  %v2564_v17 = vld [vmem:[%s3268_s4] ss:$0 sm:$0xff] }
 0xffa   : > { %v1741_v18 = vpop.xlane.xlu0 %1740 }
 0xffb   : > { %v1742_v19 = vmul.f32 %v1741_v18, %v2787_v8  ;;  %v2560_v18 = vld [vmem:[%s3192_s20] ss:$0 sm:$0xff] }
 0xffd   : > { %v1743_v20 = vsub.f32 %v3029_v15, %v1742_v19  ;;  %v1998_v19 = vpop.f32.mrf.mxu1 }
 0xfff   : > { %v1744_v21 = vmul.f32 %v1743_v20, %v1743_v20 }
0x1001   : > { %v1745_v22 = vsel %vm786_vm0, %v1744_v21, 0.0 }
0x1002   : > { %1746 = vadd.xlane.f32.xlu2 %v1745_v22 }
0x1005   : > { %v2000_v22 = vpop.f32.mrf.mxu1 }
0x1075   : > { %v1747_v25 = vpop.xlane.xlu2 %1746 }
0x1076   : > { %v1748_v26 = vmul.f32 %v1747_v25, %v2787_v8 }
0x1078   : > { %v1749_v28 = vadd.f32 1e-05, %v1748_v26 }
0x107a   : > { %2608 = vrsqrt.f32 %v1749_v28  ;;  %vm1756_vm1 = vweird.f32 %v1749_v28 }
0x1080   : > { %v2609_v29 = vpop.eup %2608 }
0x1081   : > { %v1751_v30 = vmul.f32 %v2609_v29, %v1749_v28  ;;  %vm1757_vm15 = vweird.f32 %v2609_v29 }
0x1082   : > { %vm1758_vm2 = vmor %vm1756_vm1, %vm1757_vm15 }
0x1083   : > { %v1752_v31 = vmul.f32 %v2609_v29, %v1751_v30 }
0x1085   : > { %v1753_v32 = vmul.f32 0.5, %v1752_v31 }
0x1087   : > { %v1754_v33 = vsub.f32 1.5, %v1753_v32 }
0x1089   : > { %v1755_v35 = vmul.f32 %v2609_v29, %v1754_v33 }
0x108b   : > { %v1759_v37 = vsel %vm1758_vm2, %v2609_v29, %v1755_v35 }
0x108c   : > { %v1760_v34 = vmul.f32 %v1759_v37, %v1743_v20  ;;  %v2510_v20 = vld [vmem:[%s3193_s21] sm:$0xff] }
0x108d   : > { %2033 = vmatpush.bf16.msra.mxu3 %v2510_v20 }
0x108e   : > { %v1764_v40 = vmul.f32 %v2555_v36, %v1760_v34 }
0x1090   : > { %v1768_v41 = vadd.f32 %v2556_v39, %v1764_v40  ;;  %v2561_v39 = vld [vmem:[%s3194_s22] ss:$0 sm:$0xff] }
0x1091   : > { %v2562_v40 = vld [vmem:[%s3185_s13] ss:$0 sm:$0xff] }
0x1092   : > { %v1774_v42 = vpack.c.bf16 %v1768_v41, %v1768_v41 }
0x1094   : > { %2371 = vmatmul.msk.bf16.vlgmr.msrb.gmra.mxu3 %vm786_vm0, %v1774_v42 }
0x1117   : > { %v1804_v54 = vpop.f32.mrf.mxu3 }
0x1118   : > { %v1805_v43 = vadd.f32 %v2557_v53, %v1804_v54  ;;  %v2151_v53 = vsel %vm786_vm0, %v2518_v52, 0  ;;  %v2517_v54 = vld [vmem:[%s3267_s23 + $0x28] sm:$0xff] }
0x1119   : > { %2157 = vmatpush.bf16.xpose.msra.mxu0 %v2151_v53 }
0x111a   : > { %v1809_v55 = vmul.f32 0.044715, %v1805_v43  ;;  %v1808_v61 = vmul.f32 0.5, %v1805_v43 }
0x111c   : > { %v1810_v56 = vmul.f32 %v1809_v55, %v1805_v43  ;;  %v2516_v55 = vld [vmem:[%s3267_s23 + $0x20] sm:$0xff] }
0x111e   : > { %v1811_v57 = vmul.f32 %v1810_v56, %v1805_v43 }
0x111f   : > { %v1806_v0 = vpop.f32.mrf.mxu3 }
0x1120   : > { %v1812_v58 = vadd.f32 %v1811_v57, %v1805_v43  ;;  %v2148_v43 = vsel %vm786_vm0, %v2517_v54, 0  ;;  %v2145_v57 = vsel %vm786_vm0, %v2516_v55, 0 }
0x1121   : > { %2158 = vmatpush.bf16.xpose.msra.mxu0 %v2148_v43 }
0x1122   : > { %v1813_v59 = vmul.f32 0.7978846, %v1812_v58 }
0x1124   : > { %2610 = vtanh.f32 %v1813_v59  ;;  %v2515_v59 = vld [vmem:[%s3267_s23 + $0x18] sm:$0xff] }
0x1129   : > { %2159 = vmatpush.bf16.xpose.msra.mxu0 %v2145_v57 }
0x112a   : > { %v2611_v60 = vpop.eup %2610 }
0x112b   : > { %v1815_v62 = vadd.f32 1.0, %v2611_v60 }
0x112d   : > { %v1816_v63 = vmul.f32 %v1815_v62, %v1808_v61  ;;  %v2142_v62 = vsel %vm786_vm0, %v2515_v59, 0 }
0x112f   : > { %v1834_v1 = vpack.c.bf16 %v1816_v63, %v1816_v63  ;;  %v2514_v63 = vld [vmem:[%s3267_s23 + $0x10] sm:$0xff] }
0x1131   : > { %1891 = vmatmul.bf16.vlgmr.msrb.gmra.mxu2 %v1834_v1  ;;  %2160 = vmatpush.bf16.xpose.msra.mxu0 %v2142_v62  ;;  %v2139_v1 = vsel %vm786_vm0, %v2514_v63, 0 }
0x1139   : > { %2161 = vmatpush.bf16.xpose.msra.mxu0 %v2139_v1 }
0x1141   : > { %2162 = vmatpush.bf16.xpose.msra.mxu0 %v2136_v3 }
0x1149   : > { %2163 = vmatpush.bf16.xpose.msra.mxu0 %v2133_v5 }
0x11b4   : > { %v1892_v11 = vpop.f32.mrf.mxu2 }
0x11b5   : > { %v1896_v12 = vadd.f32 %v1892_v11, %v3029_v15  ;;  %v1999_v15 = vadd.f32 %v2560_v18, %v1998_v19 }
0x11b7   : > { %v1902_v13 = vadd.f32 %v2559_v10, %v1896_v12  ;;  %v2006_v21 = vpack.c.bf16 %v1999_v15, %v1999_v15 }
0x11b9   : > { %v1905_v14 = vsel %vm786_vm0, %v1902_v13, 0.0  ;;  %2443 = vmatmul.msk.bf16.vlgmr.msra.gmra.mxu3 %vm786_vm0, %v2006_v21 }
0x11ba   : > { %1906 = vadd.xlane.f32.xlu1 %v1905_v14 }
0x11bc   : > { %v1894_v16 = vpop.f32.mrf.mxu2 }
0x122d   : > { %v1907_v38 = vpop.xlane.xlu1 %1906 }
0x122e   : > { %v1908_v23 = vmul.f32 %v1907_v38, %v2787_v8 }
0x1230   : > { %v1909_v24 = vsub.f32 %v1902_v13, %v1908_v23 }
0x1232   : > { %v1910_v25 = vmul.f32 %v1909_v24, %v1909_v24 }
0x1234   : > { %v1911_v26 = vsel %vm786_vm0, %v1910_v25, 0.0 }
0x1235   : > { %1912 = vadd.xlane.f32.xlu0 %v1911_v26 }
0x123c   : > { %v2035_v27 = vpop.f32.mrf.mxu3 }
0x123d   : > { %v2036_v45 = vadd.f32 %v2561_v39, %v2035_v27 }
0x1244   : > { %v2037_v28 = vpop.f32.mrf.mxu3 }
0x12a8   : > { %v1913_v29 = vpop.xlane.xlu0 %1912 }
0x12a9   : > { %v1914_v30 = vmul.f32 %v1913_v29, %v2787_v8 }
0x12ab   : > { %v1915_v31 = vadd.f32 1e-05, %v1914_v30 }
0x12ad   : > { %2612 = vrsqrt.f32 %v1915_v31  ;;  %vm1922_vm4 = vweird.f32 %v1915_v31 }
0x12b3   : > { %v2613_v32 = vpop.eup %2612 }
0x12b4   : > { %v1917_v33 = vmul.f32 %v2613_v32, %v1915_v31  ;;  %vm1923_vm3 = vweird.f32 %v2613_v32 }
0x12b5   : > { %vm1924_vm5 = vmor %vm1922_vm4, %vm1923_vm3 }
0x12b6   : > { %v1918_v35 = vmul.f32 %v2613_v32, %v1917_v33 }
0x12b8   : > { %v1919_v36 = vmul.f32 0.5, %v1918_v35 }
0x12ba   : > { %v1920_v37 = vsub.f32 1.5, %v1919_v36 }
0x12bc   : > { %v1921_v34 = vmul.f32 %v2613_v32, %v1920_v37 }
0x12be   : > { %v1925_v41 = vsel %vm1924_vm5, %v2613_v32, %v1921_v34 }
0x12bf   : > { %v1926_v42 = vmul.f32 %v1925_v41, %v1909_v24 }
0x12c1   : > { %v1930_v46 = vmul.f32 %v2562_v40, %v1926_v42 }
0x12c3   : > { %v1934_v47 = vadd.f32 %v2563_v44, %v1930_v46 }
0x12c5   : > { %v2039_v48 = vadd.f32 %v2036_v45, %v1934_v47 }
0x12c7   : > { %v2042_v49 = vsel %vm786_vm0, %v2039_v48, 0.0 }
0x12c8   : > { %2043 = vadd.xlane.f32.xlu2 %v2042_v49 }
0x133b   : > { %v2044_v56 = vpop.xlane.xlu2 %2043 }
0x133c   : > { %v2045_v0 = vmul.f32 %v2044_v56, %v2787_v8 }
0x133e   : > { %v2046_v58 = vsub.f32 %v2039_v48, %v2045_v0 }
0x1340   : > { %v2047_v60 = vmul.f32 %v2046_v58, %v2046_v58 }
0x1342   : > { %v2048_v61 = vsel %vm786_vm0, %v2047_v60, 0.0 }
0x1343   : > { %2049 = vadd.xlane.f32.xlu1 %v2048_v61 }
0x13b6   : > { %v2050_v6 = vpop.xlane.xlu1 %2049 }
0x13b7   : > { %v2051_v7 = vmul.f32 %v2050_v6, %v2787_v8  ;;  %v2565_v8 = vld [vmem:[%s3269_s0] ss:$0 sm:$0xff] }
0x13b9   : > { %v2052_v9 = vadd.f32 1e-05, %v2051_v7 }
0x13bb   : > { %2614 = vrsqrt.f32 %v2052_v9  ;;  %vm2059_vm7 = vweird.f32 %v2052_v9 }
0x13c1   : > { %v2615_v10 = vpop.eup %2614 }
0x13c2   : > { %v2054_v11 = vmul.f32 %v2615_v10, %v2052_v9  ;;  %vm2060_vm6 = vweird.f32 %v2615_v10 }
0x13c3   : > { %vm2061_vm8 = vmor %vm2059_vm7, %vm2060_vm6 }
0x13c4   : > { %v2055_v12 = vmul.f32 %v2615_v10, %v2054_v11 }
0x13c6   : > { %v2056_v13 = vmul.f32 0.5, %v2055_v12 }
0x13c8   : > { %v2057_v14 = vsub.f32 1.5, %v2056_v13 }
0x13ca   : > { %v2058_v16 = vmul.f32 %v2615_v10, %v2057_v14 }
0x13cc   : > { %v2062_v18 = vsel %vm2061_vm8, %v2615_v10, %v2058_v16 }
0x13cd   : > { %v2063_v19 = vmul.f32 %v2062_v18, %v2046_v58 }
0x13cf   : > { %v2067_v20 = vmul.f32 %v2564_v17, %v2063_v19 }
0x13d1   : > { %v2071_v15 = vadd.f32 %v2565_v8, %v2067_v20 }
0x13d3   : > { %v2072_v21 = vpack.c.bf16 %v2071_v15, %v2071_v15 }
0x13d5   : > { %2476 = vmatmul.msk.bf16.vlgmr.msra.gmra.mxu0 %vm786_vm0, %v2072_v21 }
0x1452   : > { %v2165_v22 = vpop.f32.mrf.mxu0 }
0x1453   : > { %2169 = vst [vmem:[%s776_s28] sm:$0xff] %v2165_v22 }
0x145a   : > { %v2167_v38 = vpop.f32.mrf.mxu0 }
0x145b PF: > { %s3271_s26 = sld [smem:[#allocation2_spill]] }
0x1461   : > { %s35_s29 = sadd.s32 1, %s3271_s26  }
0x1462   : > { %p32_p4 = scmp.ge.s32.totalorder %s35_s29, 4  }
0x1464   :  { %34 = sbr.rel (!%p32_p4) target bundleno = 16 (0x10), region = 165 }

</bundles_post_ra>
